<compile_context>
chip_gen: v7x
topology: tpu7x:2x2x1
jax: 0.10.0
libtpu: 0.0.40
codegen_flags: <defaults>
</compile_context>

<pallas_src>
import functools
import math

import jax
import jax.numpy as jnp
from jax.experimental import pallas as pl
from jax.experimental.pallas import tpu as pltpu

_LN_EPS = 1e-5                # torch.nn.LayerNorm default
_LOG_H0 = math.log(0.5)       # log_g(0) = log(0.5)


# ----------------------------- in-kernel math -------------------------------
def _softplus(x):
    # numerically stable softplus (matches F.softplus)
    return jnp.maximum(x, 0.0) + jnp.log(1.0 + jnp.exp(-jnp.abs(x)))


def _log_g(x):
    # log_g(x) = where(x >= 0, log(relu(x) + 0.5), -softplus(-x))
    return jnp.where(x >= 0.0,
                     jnp.log(jnp.maximum(x, 0.0) + 0.5),
                     -_softplus(-x))


def _layernorm(x, gamma, beta):
    mu = jnp.mean(x, axis=-1, keepdims=True)
    xc = x - mu
    var = jnp.mean(xc * xc, axis=-1, keepdims=True)
    return xc * jax.lax.rsqrt(var + _LN_EPS) * gamma + beta


def _mm(x, w, b):
    # bf16 inputs onto the MXU, f32 accumulation (review: bf16 matmuls on v5e/v6e/v7x)
    y = jnp.dot(x.astype(jnp.bfloat16), w.astype(jnp.bfloat16),
                preferred_element_type=jnp.float32)
    return y + b


def _gelu_exact(x):
    # nn.GELU() default (approximate='none'): x * Phi(x)
    return 0.5 * x * (1.0 + jax.lax.erf(x * (1.0 / math.sqrt(2.0))))


def _cumsum_rows(scratch, vals, n_rows):
    """Inclusive prefix sum along rows (time axis), Hillis-Steele style.

    Full 128-lane width per step, ceil(log2(T)) shifted adds into a VMEM
    scratch ref -- replaces the old per-timestep (B,1,E) recurrence.
    """
    scratch[...] = vals
    d = 1
    while d < n_rows:
        scratch[pl.ds(d, n_rows - d), :] = (
            scratch[pl.ds(d, n_rows - d), :] + scratch[pl.ds(0, n_rows - d), :])
        d *= 2
    return scratch[...]


# --------------------------------- kernel -----------------------------------
def minlstm_cell_kernel(
        x_ref,
        ln1_g_ref, ln1_b_ref,
        w_dw_ref, b_dw_ref, w_pw_ref, b_pw_ref,
        ln2_g_ref, ln2_b_ref,
        w_gates_ref, b_gates_ref,
        ln3_g_ref, ln3_b_ref,
        w_mlp1_ref, b_mlp1_ref, w_mlp2_ref, b_mlp2_ref,
        out_ref,
        scratch,
        *, kernel_size, seq_len):
    T = seq_len
    x = x_ref[...].astype(jnp.float32)          # (T, D): batch dim is squeezed
    D = x.shape[-1]
    E = D                                       # expansion_factor == 1.0

    # -------- block 1: x = CausalDepthWiseConv1d(ln1(x)) + x ----------------
    residual = x
    h = _layernorm(x, ln1_g_ref[...], ln1_b_ref[...])
    w_dw = w_dw_ref[...]                        # (K, D) depthwise taps
    scratch[...] = jnp.broadcast_to(b_dw_ref[...], (T, D))
    for k in range(kernel_size):                # tap k looks back (K-1-k) steps
        s = kernel_size - 1 - k
        scratch[pl.ds(s, T - s), :] = (
            scratch[pl.ds(s, T - s), :] + w_dw[k:k + 1, :] * h[:T - s, :])
    x = _mm(scratch[...], w_pw_ref[...], b_pw_ref[...]) + residual  # 1x1 conv
    residual = x

    # -------- block 2: x = minLSTM(ln2(x)) + x -------------------------------
    h = _layernorm(x, ln2_g_ref[...], ln2_b_ref[...])
    gates = _mm(h, w_gates_ref[...], b_gates_ref[...])   # fused (T, 3E) matmul
    k_f = gates[:, :E]
    k_i = gates[:, E:2 * E]
    k_h = gates[:, 2 * E:]
    log_f = -_softplus(-k_f)
    log_b = -_softplus(-k_i) + _log_g(k_h)

    # parallel_scan_log, vectorized over all T timesteps:
    #   h_t = exp(A_t) * (h0 + sum_{j<=t} exp(log_b_j - A_j)),  A_t = cumsum(log_f),
    #   h0 = exp(log_g(0)) = 0.5 ; numerically stabilized with the global max m.
    a_star = _cumsum_rows(scratch, log_f, T)
    z = log_b - a_star
    m = jnp.maximum(jnp.max(z, axis=0, keepdims=True), _LOG_H0)
    s_cum = _cumsum_rows(scratch, jnp.exp(z - m), T)
    h_t = jnp.exp(a_star + m + jnp.log(jnp.exp(_LOG_H0 - m) + s_cum))
    x = h_t + residual                          # expansion 1.0 -> no down_projection
    residual = x

    # -------- block 3: x = MLP(ln3(x)) + x -----------------------------------
    h = _layernorm(x, ln3_g_ref[...], ln3_b_ref[...])
    y = _gelu_exact(_mm(h, w_mlp1_ref[...], b_mlp1_ref[...]))
    y = _mm(y, w_mlp2_ref[...], b_mlp2_ref[...])
    out_ref[...] = (y + residual).astype(out_ref.dtype)


# -------------------------------- wrapper ------------------------------------
_PARAM_ORDER = ("ln1_g", "ln1_b", "w_dw", "b_dw", "w_pw", "b_pw",
                "ln2_g", "ln2_b", "w_gates", "b_gates",
                "ln3_g", "ln3_b", "w_mlp1", "b_mlp1", "w_mlp2", "b_mlp2")


def minlstm_cell_forward(x, params, *, kernel_size):
    B, T, D = x.shape
    assert kernel_size <= T
    p_args = [params[k] for k in _PARAM_ORDER]

    def resident(arr):
        # full-array block with a constant index_map -> fetched once, stays in VMEM
        nd = arr.ndim
        return pl.BlockSpec(arr.shape, lambda b, _nd=nd: (0,) * _nd)

    act_spec = pl.BlockSpec((pl.Squeezed(), T, D), lambda b: (b, 0, 0))

    kernel = functools.partial(minlstm_cell_kernel,
                               kernel_size=kernel_size, seq_len=T)
    return pl.pallas_call(
        kernel,
        grid=(B,),                               # batch-tiled grid
        out_shape=jax.ShapeDtypeStruct((B, T, D), jnp.float32),
        in_specs=[act_spec] + [resident(p) for p in p_args],
        out_specs=act_spec,
        scratch_shapes=[pltpu.VMEM((T, D), jnp.float32)],
        compiler_params=pltpu.CompilerParams(
            dimension_semantics=("parallel",),   # megacore sharding on v7x
            vmem_limit_bytes=32 * 1024 * 1024),  # explicit scoped-VMEM budget
    )(x, *p_args)


# --------------------------- deterministic params ----------------------------
def init_params(key, dim, kernel_size, mult=4):
    E = dim                  # expansion_factor == 1.0
    H = int(mult * dim)
    ks = jax.random.split(key, 8)
    s_d = 1.0 / math.sqrt(dim)
    s_h = 1.0 / math.sqrt(H)

    def w(k, shape, scale):
        return scale * jax.random.normal(k, shape, jnp.float32)

    return {
        "ln1_g": jnp.ones((1, dim), jnp.float32),
        "ln1_b": jnp.zeros((1, dim), jnp.float32),
        # depthwise conv: (K, D) == torch weight (D, 1, K) transposed
        "w_dw": w(ks[0], (kernel_size, dim), s_d),
        "b_dw": jnp.full((1, dim), 0.01, jnp.float32),
        # pointwise 1x1 conv: (Din, Dout)
        "w_pw": w(ks[1], (dim, dim), s_d),
        "b_pw": jnp.full((1, dim), -0.01, jnp.float32),
        "ln2_g": jnp.ones((1, dim), jnp.float32),
        "ln2_b": jnp.zeros((1, dim), jnp.float32),
        # fused nn.Linear(dim, 3*E): chunks are (f, i, h)
        "w_gates": w(ks[2], (dim, 3 * E), s_d),
        "b_gates": w(ks[3], (1, 3 * E), s_d),
        "ln3_g": jnp.ones((1, dim), jnp.float32),
        "ln3_b": jnp.zeros((1, dim), jnp.float32),
        "w_mlp1": w(ks[4], (dim, H), s_d),
        "b_mlp1": jnp.zeros((1, H), jnp.float32),
        "w_mlp2": w(ks[5], (H, dim), s_h),
        "b_mlp2": jnp.zeros((1, dim), jnp.float32),
    }


# -------------------------- pure-JAX reference -------------------------------
def reference_forward(x, params, *, kernel_size):
    def layernorm(v, g, b):
        mu = jnp.mean(v, -1, keepdims=True)
        var = jnp.mean((v - mu) ** 2, -1, keepdims=True)
        return (v - mu) / jnp.sqrt(var + _LN_EPS) * g + b

    def softplus(v):
        return jnp.logaddexp(v, 0.0)

    def log_g(v):
        return jnp.where(v >= 0, jnp.log(jax.nn.relu(v) + 0.5), -softplus(-v))

    def mm(v, w, b):   # mirrors the kernel's bf16-input / f32-accumulate matmuls
        return jnp.einsum("btd,de->bte",
                          v.astype(jnp.bfloat16), w.astype(jnp.bfloat16),
                          preferred_element_type=jnp.float32) + b

    B, T, D = x.shape
    residual = x
    h = layernorm(x, params["ln1_g"], params["ln1_b"])
    hp = jnp.pad(h, ((0, 0), (kernel_size - 1, 0), (0, 0)))
    dw = jnp.broadcast_to(params["b_dw"], h.shape)
    for k in range(kernel_size):
        dw = dw + params["w_dw"][k][None, None, :] * hp[:, k:k + T, :]
    x1 = mm(dw, params["w_pw"], params["b_pw"]) + residual
    residual = x1

    h = layernorm(x1, params["ln2_g"], params["ln2_b"])
    gates = mm(h, params["w_gates"], params["b_gates"])
    k_f, k_i, k_h = jnp.split(gates, 3, axis=-1)
    log_f = -softplus(-k_f)
    log_values = jnp.concatenate(
        [jnp.full((B, 1, D), _LOG_H0), -softplus(-k_i) + log_g(k_h)], axis=1)
    a_star = jnp.pad(jnp.cumsum(log_f, axis=1), ((0, 0), (1, 0), (0, 0)))
    z = log_values - a_star
    m = jnp.max(z, axis=1, keepdims=True)
    lcse = jnp.log(jnp.cumsum(jnp.exp(z - m), axis=1)) + m   # logcumsumexp
    h_t = jnp.exp(a_star + lcse)[:, 1:]
    x2 = h_t + residual
    residual = x2

    h = layernorm(x2, params["ln3_g"], params["ln3_b"])
    y = mm(h, params["w_mlp1"], params["b_mlp1"])
    y = 0.5 * y * (1.0 + jax.lax.erf(y / math.sqrt(2.0)))
    y = mm(y, params["w_mlp2"], params["b_mlp2"])
    return y + residual


if __name__ == "__main__":
    # lane/sublane-aligned small config: T multiple of 8, D multiple of 128
    B, T, D, K = 4, 16, 128, 3
    key = jax.random.PRNGKey(0)
    kx, kp = jax.random.split(key)
    x = jax.random.normal(kx, (B, T, D), jnp.float32)
    params = init_params(kp, D, K)

    out = jax.block_until_ready(minlstm_cell_forward(x, params, kernel_size=K))

    ref = reference_forward(x, params, kernel_size=K)
    err = float(jnp.max(jnp.abs(out - ref)))
    assert err < 2e-3, f"mismatch vs reference: max abs err = {err}"
    print("KERNEL_OK")
</pallas_src>

<mosaic_0001>
module attributes {stable_mosaic.version = 11 : i64} {
  func.func @minlstm_cell_kernel(%arg0: i32, %arg1: memref<1x16x128xf32, #tpu.memory_space<vmem>>, %arg2: memref<1x128xf32, #tpu.memory_space<vmem>>, %arg3: memref<1x128xf32, #tpu.memory_space<vmem>>, %arg4: memref<3x128xf32, #tpu.memory_space<vmem>>, %arg5: memref<1x128xf32, #tpu.memory_space<vmem>>, %arg6: memref<128x128xf32, #tpu.memory_space<vmem>>, %arg7: memref<1x128xf32, #tpu.memory_space<vmem>>, %arg8: memref<1x128xf32, #tpu.memory_space<vmem>>, %arg9: memref<1x128xf32, #tpu.memory_space<vmem>>, %arg10: memref<128x384xf32, #tpu.memory_space<vmem>>, %arg11: memref<1x384xf32, #tpu.memory_space<vmem>>, %arg12: memref<1x128xf32, #tpu.memory_space<vmem>>, %arg13: memref<1x128xf32, #tpu.memory_space<vmem>>, %arg14: memref<128x512xf32, #tpu.memory_space<vmem>>, %arg15: memref<1x512xf32, #tpu.memory_space<vmem>>, %arg16: memref<512x128xf32, #tpu.memory_space<vmem>>, %arg17: memref<1x128xf32, #tpu.memory_space<vmem>>, %arg18: memref<1x16x128xf32, #tpu.memory_space<vmem>>, %arg19: memref<16x128xf32, #tpu.memory_space<vmem>>) attributes {dimension_semantics = [#tpu.dimension_semantics<parallel>], iteration_bounds = array<i64: 4>, scalar_prefetch = 0 : i64, scratch_operands = 1 : i64, tpu.core_type = #tpu.core_type<tc>, window_params = [{transform_indices = @transform_0, window_bounds = array<i64: 1, 16, 128>}, {pipeline_mode = #tpu.pipeline_mode<synchronous>, transform_indices = @transform_1, window_bounds = array<i64: 1, 128>}, {pipeline_mode = #tpu.pipeline_mode<synchronous>, transform_indices = @transform_2, window_bounds = array<i64: 1, 128>}, {pipeline_mode = #tpu.pipeline_mode<synchronous>, transform_indices = @transform_3, window_bounds = array<i64: 3, 128>}, {pipeline_mode = #tpu.pipeline_mode<synchronous>, transform_indices = @transform_4, window_bounds = array<i64: 1, 128>}, {pipeline_mode = #tpu.pipeline_mode<synchronous>, transform_indices = @transform_5, window_bounds = array<i64: 128, 128>}, {pipeline_mode = #tpu.pipeline_mode<synchronous>, transform_indices = @transform_6, window_bounds = array<i64: 1, 128>}, {pipeline_mode = #tpu.pipeline_mode<synchronous>, transform_indices = @transform_7, window_bounds = array<i64: 1, 128>}, {pipeline_mode = #tpu.pipeline_mode<synchronous>, transform_indices = @transform_8, window_bounds = array<i64: 1, 128>}, {pipeline_mode = #tpu.pipeline_mode<synchronous>, transform_indices = @transform_9, window_bounds = array<i64: 128, 384>}, {pipeline_mode = #tpu.pipeline_mode<synchronous>, transform_indices = @transform_10, window_bounds = array<i64: 1, 384>}, {pipeline_mode = #tpu.pipeline_mode<synchronous>, transform_indices = @transform_11, window_bounds = array<i64: 1, 128>}, {pipeline_mode = #tpu.pipeline_mode<synchronous>, transform_indices = @transform_12, window_bounds = array<i64: 1, 128>}, {pipeline_mode = #tpu.pipeline_mode<synchronous>, transform_indices = @transform_13, window_bounds = array<i64: 128, 512>}, {pipeline_mode = #tpu.pipeline_mode<synchronous>, transform_indices = @transform_14, window_bounds = array<i64: 1, 512>}, {pipeline_mode = #tpu.pipeline_mode<synchronous>, transform_indices = @transform_15, window_bounds = array<i64: 512, 128>}, {pipeline_mode = #tpu.pipeline_mode<synchronous>, transform_indices = @transform_16, window_bounds = array<i64: 1, 128>}, {transform_indices = @transform_17, window_bounds = array<i64: 1, 16, 128>}]} {
    %c0 = arith.constant 0 : index
    %c0_0 = arith.constant 0 : index
    %c0_1 = arith.constant 0 : index
    %0 = vector.load %arg1[%c0, %c0_0, %c0_1] : memref<1x16x128xf32, #tpu.memory_space<vmem>>, vector<1x16x128xf32>
    %1 = vector.shape_cast %0 : vector<1x16x128xf32> to vector<16x128xf32>
    %c0_2 = arith.constant 0 : index
    %c0_3 = arith.constant 0 : index
    %2 = vector.load %arg2[%c0_2, %c0_3] : memref<1x128xf32, #tpu.memory_space<vmem>>, vector<1x128xf32>
    %c0_4 = arith.constant 0 : index
    %c0_5 = arith.constant 0 : index
    %3 = vector.load %arg3[%c0_4, %c0_5] : memref<1x128xf32, #tpu.memory_space<vmem>>, vector<1x128xf32>
    %cst = arith.constant dense<0.000000e+00> : vector<16xf32>
    %4 = vector.multi_reduction <add>, %1, %cst [1] : vector<16x128xf32> to vector<16xf32>
    %5 = vector.shape_cast %4 : vector<16xf32> to vector<16x1xf32>
    %cst_6 = arith.constant 1.280000e+02 : f32
    %6 = vector.broadcast %cst_6 : f32 to vector<16x1xf32>
    %7 = arith.divf %5, %6 : vector<16x1xf32>
    %8 = vector.broadcast %7 : vector<16x1xf32> to vector<16x128xf32>
    %9 = arith.subf %1, %8 : vector<16x128xf32>
    %10 = arith.mulf %9, %9 : vector<16x128xf32>
    %cst_7 = arith.constant dense<0.000000e+00> : vector<16xf32>
    %11 = vector.multi_reduction <add>, %10, %cst_7 [1] : vector<16x128xf32> to vector<16xf32>
    %12 = vector.shape_cast %11 : vector<16xf32> to vector<16x1xf32>
    %cst_8 = arith.constant 1.280000e+02 : f32
    %13 = vector.broadcast %cst_8 : f32 to vector<16x1xf32>
    %14 = arith.divf %12, %13 : vector<16x1xf32>
    %cst_9 = arith.constant 9.99999974E-6 : f32
    %15 = vector.broadcast %cst_9 : f32 to vector<16x1xf32>
    %16 = arith.addf %14, %15 : vector<16x1xf32>
    %17 = math.rsqrt %16 : vector<16x1xf32>
    %18 = vector.broadcast %17 : vector<16x1xf32> to vector<16x128xf32>
    %19 = arith.mulf %9, %18 : vector<16x128xf32>
    %20 = vector.broadcast %2 : vector<1x128xf32> to vector<16x128xf32>
    %21 = arith.mulf %19, %20 : vector<16x128xf32>
    %22 = vector.broadcast %3 : vector<1x128xf32> to vector<16x128xf32>
    %23 = arith.addf %21, %22 : vector<16x128xf32>
    %c0_10 = arith.constant 0 : index
    %c0_11 = arith.constant 0 : index
    %24 = vector.load %arg4[%c0_10, %c0_11] : memref<3x128xf32, #tpu.memory_space<vmem>>, vector<3x128xf32>
    %c0_12 = arith.constant 0 : index
    %c0_13 = arith.constant 0 : index
    %25 = vector.load %arg5[%c0_12, %c0_13] : memref<1x128xf32, #tpu.memory_space<vmem>>, vector<1x128xf32>
    %26 = vector.shape_cast %25 : vector<1x128xf32> to vector<1x128xf32>
    %27 = vector.broadcast %26 : vector<1x128xf32> to vector<16x128xf32>
    %c0_14 = arith.constant 0 : index
    %c0_15 = arith.constant 0 : index
    %28 = vector.load %arg19[%c0_14, %c0_15] : memref<16x128xf32, #tpu.memory_space<vmem>>, vector<16x128xf32>
    tpu.vector_store %arg19[%c0_14, %c0_15], %27 {strides = array<i32>} : memref<16x128xf32, #tpu.memory_space<vmem>>, vector<16x128xf32>,
    %c2 = arith.constant 2 : index
    %c0_16 = arith.constant 0 : index
    %29 = vector.load %arg19[%c2, %c0_16] : memref<16x128xf32, #tpu.memory_space<vmem>>, vector<14x128xf32>
    %30 = vector.extract_strided_slice %24 {offsets = [0, 0], sizes = [1, 128], strides = [1, 1]} : vector<3x128xf32> to vector<1x128xf32>
    %31 = vector.extract_strided_slice %23 {offsets = [0, 0], sizes = [14, 128], strides = [1, 1]} : vector<16x128xf32> to vector<14x128xf32>
    %32 = vector.broadcast %30 : vector<1x128xf32> to vector<14x128xf32>
    %33 = arith.mulf %32, %31 : vector<14x128xf32>
    %34 = arith.addf %29, %33 : vector<14x128xf32>
    %c2_17 = arith.constant 2 : index
    %c0_18 = arith.constant 0 : index
    %35 = vector.load %arg19[%c2_17, %c0_18] : memref<16x128xf32, #tpu.memory_space<vmem>>, vector<14x128xf32>
    tpu.vector_store %arg19[%c2_17, %c0_18], %34 {strides = array<i32>} : memref<16x128xf32, #tpu.memory_space<vmem>>, vector<14x128xf32>,
    %c1 = arith.constant 1 : index
    %c0_19 = arith.constant 0 : index
    %36 = vector.load %arg19[%c1, %c0_19] : memref<16x128xf32, #tpu.memory_space<vmem>>, vector<15x128xf32>
    %37 = vector.extract_strided_slice %24 {offsets = [1, 0], sizes = [1, 128], strides = [1, 1]} : vector<3x128xf32> to vector<1x128xf32>
    %38 = vector.extract_strided_slice %23 {offsets = [0, 0], sizes = [15, 128], strides = [1, 1]} : vector<16x128xf32> to vector<15x128xf32>
    %39 = vector.broadcast %37 : vector<1x128xf32> to vector<15x128xf32>
    %40 = arith.mulf %39, %38 : vector<15x128xf32>
    %41 = arith.addf %36, %40 : vector<15x128xf32>
    %c1_20 = arith.constant 1 : index
    %c0_21 = arith.constant 0 : index
    %42 = vector.load %arg19[%c1_20, %c0_21] : memref<16x128xf32, #tpu.memory_space<vmem>>, vector<15x128xf32>
    tpu.vector_store %arg19[%c1_20, %c0_21], %41 {strides = array<i32>} : memref<16x128xf32, #tpu.memory_space<vmem>>, vector<15x128xf32>,
    %c0_22 = arith.constant 0 : index
    %c0_23 = arith.constant 0 : index
    %43 = vector.load %arg19[%c0_22, %c0_23] : memref<16x128xf32, #tpu.memory_space<vmem>>, vector<16x128xf32>
    %44 = vector.extract_strided_slice %24 {offsets = [2, 0], sizes = [1, 128], strides = [1, 1]} : vector<3x128xf32> to vector<1x128xf32>
    %45 = vector.broadcast %44 : vector<1x128xf32> to vector<16x128xf32>
    %46 = arith.mulf %45, %23 : vector<16x128xf32>
    %47 = arith.addf %43, %46 : vector<16x128xf32>
    %c0_24 = arith.constant 0 : index
    %c0_25 = arith.constant 0 : index
    %48 = vector.load %arg19[%c0_24, %c0_25] : memref<16x128xf32, #tpu.memory_space<vmem>>, vector<16x128xf32>
    tpu.vector_store %arg19[%c0_24, %c0_25], %47 {strides = array<i32>} : memref<16x128xf32, #tpu.memory_space<vmem>>, vector<16x128xf32>,
    %c0_26 = arith.constant 0 : index
    %c0_27 = arith.constant 0 : index
    %49 = vector.load %arg19[%c0_26, %c0_27] : memref<16x128xf32, #tpu.memory_space<vmem>>, vector<16x128xf32>
    %c0_28 = arith.constant 0 : index
    %c0_29 = arith.constant 0 : index
    %50 = vector.load %arg6[%c0_28, %c0_29] : memref<128x128xf32, #tpu.memory_space<vmem>>, vector<128x128xf32>
    %c0_30 = arith.constant 0 : index
    %c0_31 = arith.constant 0 : index
    %51 = vector.load %arg7[%c0_30, %c0_31] : memref<1x128xf32, #tpu.memory_space<vmem>>, vector<1x128xf32>
    %52 = arith.truncf %49 : vector<16x128xf32> to vector<16x128xbf16>
    %53 = arith.truncf %50 : vector<128x128xf32> to vector<128x128xbf16>
    %cst_32 = arith.constant dense<0.000000e+00> : vector<16x128xf32>
    %54 = tpu.matmul %52, %53, %cst_32 {dimension_numbers = #tpu.dot_dimension_numbers<[1], [0], [0], [1], [0, 0, 1, 1], [], []>} : vector<16x128xbf16>, vector<128x128xbf16>, vector<16x128xf32> -> vector<16x128xf32>
    %55 = vector.broadcast %51 : vector<1x128xf32> to vector<16x128xf32>
    %56 = arith.addf %54, %55 : vector<16x128xf32>
    %57 = arith.addf %56, %1 : vector<16x128xf32>
    %c0_33 = arith.constant 0 : index
    %c0_34 = arith.constant 0 : index
    %58 = vector.load %arg8[%c0_33, %c0_34] : memref<1x128xf32, #tpu.memory_space<vmem>>, vector<1x128xf32>
    %c0_35 = arith.constant 0 : index
    %c0_36 = arith.constant 0 : index
    %59 = vector.load %arg9[%c0_35, %c0_36] : memref<1x128xf32, #tpu.memory_space<vmem>>, vector<1x128xf32>
    %cst_37 = arith.constant dense<0.000000e+00> : vector<16xf32>
    %60 = vector.multi_reduction <add>, %57, %cst_37 [1] : vector<16x128xf32> to vector<16xf32>
    %61 = vector.shape_cast %60 : vector<16xf32> to vector<16x1xf32>
    %cst_38 = arith.constant 1.280000e+02 : f32
    %62 = vector.broadcast %cst_38 : f32 to vector<16x1xf32>
    %63 = arith.divf %61, %62 : vector<16x1xf32>
    %64 = vector.broadcast %63 : vector<16x1xf32> to vector<16x128xf32>
    %65 = arith.subf %57, %64 : vector<16x128xf32>
    %66 = arith.mulf %65, %65 : vector<16x128xf32>
    %cst_39 = arith.constant dense<0.000000e+00> : vector<16xf32>
    %67 = vector.multi_reduction <add>, %66, %cst_39 [1] : vector<16x128xf32> to vector<16xf32>
    %68 = vector.shape_cast %67 : vector<16xf32> to vector<16x1xf32>
    %cst_40 = arith.constant 1.280000e+02 : f32
    %69 = vector.broadcast %cst_40 : f32 to vector<16x1xf32>
    %70 = arith.divf %68, %69 : vector<16x1xf32>
    %cst_41 = arith.constant 9.99999974E-6 : f32
    %71 = vector.broadcast %cst_41 : f32 to vector<16x1xf32>
    %72 = arith.addf %70, %71 : vector<16x1xf32>
    %73 = math.rsqrt %72 : vector<16x1xf32>
    %74 = vector.broadcast %73 : vector<16x1xf32> to vector<16x128xf32>
    %75 = arith.mulf %65, %74 : vector<16x128xf32>
    %76 = vector.broadcast %58 : vector<1x128xf32> to vector<16x128xf32>
    %77 = arith.mulf %75, %76 : vector<16x128xf32>
    %78 = vector.broadcast %59 : vector<1x128xf32> to vector<16x128xf32>
    %79 = arith.addf %77, %78 : vector<16x128xf32>
    %c0_42 = arith.constant 0 : index
    %c0_43 = arith.constant 0 : index
    %80 = vector.load %arg10[%c0_42, %c0_43] : memref<128x384xf32, #tpu.memory_space<vmem>>, vector<128x384xf32>
    %c0_44 = arith.constant 0 : index
    %c0_45 = arith.constant 0 : index
    %81 = vector.load %arg11[%c0_44, %c0_45] : memref<1x384xf32, #tpu.memory_space<vmem>>, vector<1x384xf32>
    %82 = arith.truncf %79 : vector<16x128xf32> to vector<16x128xbf16>
    %83 = arith.truncf %80 : vector<128x384xf32> to vector<128x384xbf16>
    %cst_46 = arith.constant dense<0.000000e+00> : vector<16x384xf32>
    %84 = tpu.matmul %82, %83, %cst_46 {dimension_numbers = #tpu.dot_dimension_numbers<[1], [0], [0], [1], [0, 0, 1, 1], [], []>} : vector<16x128xbf16>, vector<128x384xbf16>, vector<16x384xf32> -> vector<16x384xf32>
    %85 = vector.broadcast %81 : vector<1x384xf32> to vector<16x384xf32>
    %86 = arith.addf %84, %85 : vector<16x384xf32>
    %87 = vector.extract_strided_slice %86 {offsets = [0, 0], sizes = [16, 128], strides = [1, 1]} : vector<16x384xf32> to vector<16x128xf32>
    %88 = vector.extract_strided_slice %86 {offsets = [0, 128], sizes = [16, 128], strides = [1, 1]} : vector<16x384xf32> to vector<16x128xf32>
    %89 = vector.extract_strided_slice %86 {offsets = [0, 256], sizes = [16, 128], strides = [1, 1]} : vector<16x384xf32> to vector<16x128xf32>
    %cst_47 = arith.constant 0.000000e+00 : f32
    %90 = vector.broadcast %cst_47 : f32 to vector<16x128xf32>
    %91 = arith.subf %90, %87 : vector<16x128xf32>
    %cst_48 = arith.constant 0.000000e+00 : f32
    %92 = vector.broadcast %cst_48 : f32 to vector<16x128xf32>
    %93 = arith.maximumf %91, %92 : vector<16x128xf32>
    %94 = math.absf %91 : vector<16x128xf32>
    %cst_49 = arith.constant 0.000000e+00 : f32
    %95 = vector.broadcast %cst_49 : f32 to vector<16x128xf32>
    %96 = arith.subf %95, %94 : vector<16x128xf32>
    %97 = math.exp %96 : vector<16x128xf32>
    %cst_50 = arith.constant 1.000000e+00 : f32
    %98 = vector.broadcast %cst_50 : f32 to vector<16x128xf32>
    %99 = arith.addf %98, %97 : vector<16x128xf32>
    %100 = math.log %99 : vector<16x128xf32>
    %101 = arith.addf %93, %100 : vector<16x128xf32>
    %cst_51 = arith.constant 0.000000e+00 : f32
    %102 = vector.broadcast %cst_51 : f32 to vector<16x128xf32>
    %103 = arith.subf %102, %101 : vector<16x128xf32>
    %cst_52 = arith.constant 0.000000e+00 : f32
    %104 = vector.broadcast %cst_52 : f32 to vector<16x128xf32>
    %105 = arith.subf %104, %88 : vector<16x128xf32>
    %cst_53 = arith.constant 0.000000e+00 : f32
    %106 = vector.broadcast %cst_53 : f32 to vector<16x128xf32>
    %107 = arith.maximumf %105, %106 : vector<16x128xf32>
    %108 = math.absf %105 : vector<16x128xf32>
    %cst_54 = arith.constant 0.000000e+00 : f32
    %109 = vector.broadcast %cst_54 : f32 to vector<16x128xf32>
    %110 = arith.subf %109, %108 : vector<16x128xf32>
    %111 = math.exp %110 : vector<16x128xf32>
    %cst_55 = arith.constant 1.000000e+00 : f32
    %112 = vector.broadcast %cst_55 : f32 to vector<16x128xf32>
    %113 = arith.addf %112, %111 : vector<16x128xf32>
    %114 = math.log %113 : vector<16x128xf32>
    %115 = arith.addf %107, %114 : vector<16x128xf32>
    %cst_56 = arith.constant 0.000000e+00 : f32
    %116 = vector.broadcast %cst_56 : f32 to vector<16x128xf32>
    %117 = arith.subf %116, %115 : vector<16x128xf32>
    %cst_57 = arith.constant 0.000000e+00 : f32
    %118 = vector.broadcast %cst_57 : f32 to vector<16x128xf32>
    %119 = arith.cmpf oge, %89, %118 : vector<16x128xf32>
    %cst_58 = arith.constant 0.000000e+00 : f32
    %120 = vector.broadcast %cst_58 : f32 to vector<16x128xf32>
    %121 = arith.maximumf %89, %120 : vector<16x128xf32>
    %cst_59 = arith.constant 5.000000e-01 : f32
    %122 = vector.broadcast %cst_59 : f32 to vector<16x128xf32>
    %123 = arith.addf %121, %122 : vector<16x128xf32>
    %124 = math.log %123 : vector<16x128xf32>
    %cst_60 = arith.constant 0.000000e+00 : f32
    %125 = vector.broadcast %cst_60 : f32 to vector<16x128xf32>
    %126 = arith.subf %125, %89 : vector<16x128xf32>
    %cst_61 = arith.constant 0.000000e+00 : f32
    %127 = vector.broadcast %cst_61 : f32 to vector<16x128xf32>
    %128 = arith.maximumf %126, %127 : vector<16x128xf32>
    %129 = math.absf %126 : vector<16x128xf32>
    %cst_62 = arith.constant 0.000000e+00 : f32
    %130 = vector.broadcast %cst_62 : f32 to vector<16x128xf32>
    %131 = arith.subf %130, %129 : vector<16x128xf32>
    %132 = math.exp %131 : vector<16x128xf32>
    %cst_63 = arith.constant 1.000000e+00 : f32
    %133 = vector.broadcast %cst_63 : f32 to vector<16x128xf32>
    %134 = arith.addf %133, %132 : vector<16x128xf32>
    %135 = math.log %134 : vector<16x128xf32>
    %136 = arith.addf %128, %135 : vector<16x128xf32>
    %cst_64 = arith.constant 0.000000e+00 : f32
    %137 = vector.broadcast %cst_64 : f32 to vector<16x128xf32>
    %138 = arith.subf %137, %136 : vector<16x128xf32>
    %139 = arith.select %119, %124, %138 : vector<16x128xi1>, vector<16x128xf32>
    %140 = arith.addf %117, %139 : vector<16x128xf32>
    %c0_65 = arith.constant 0 : index
    %c0_66 = arith.constant 0 : index
    %141 = vector.load %arg19[%c0_65, %c0_66] : memref<16x128xf32, #tpu.memory_space<vmem>>, vector<16x128xf32>
    tpu.vector_store %arg19[%c0_65, %c0_66], %103 {strides = array<i32>} : memref<16x128xf32, #tpu.memory_space<vmem>>, vector<16x128xf32>,
    %c1_67 = arith.constant 1 : index
    %c0_68 = arith.constant 0 : index
    %142 = vector.load %arg19[%c1_67, %c0_68] : memref<16x128xf32, #tpu.memory_space<vmem>>, vector<15x128xf32>
    %c0_69 = arith.constant 0 : index
    %c0_70 = arith.constant 0 : index
    %143 = vector.load %arg19[%c0_69, %c0_70] : memref<16x128xf32, #tpu.memory_space<vmem>>, vector<15x128xf32>
    %144 = arith.addf %142, %143 : vector<15x128xf32>
    %c1_71 = arith.constant 1 : index
    %c0_72 = arith.constant 0 : index
    %145 = vector.load %arg19[%c1_71, %c0_72] : memref<16x128xf32, #tpu.memory_space<vmem>>, vector<15x128xf32>
    tpu.vector_store %arg19[%c1_71, %c0_72], %144 {strides = array<i32>} : memref<16x128xf32, #tpu.memory_space<vmem>>, vector<15x128xf32>,
    %c2_73 = arith.constant 2 : index
    %c0_74 = arith.constant 0 : index
    %146 = vector.load %arg19[%c2_73, %c0_74] : memref<16x128xf32, #tpu.memory_space<vmem>>, vector<14x128xf32>
    %c0_75 = arith.constant 0 : index
    %c0_76 = arith.constant 0 : index
    %147 = vector.load %arg19[%c0_75, %c0_76] : memref<16x128xf32, #tpu.memory_space<vmem>>, vector<14x128xf32>
    %148 = arith.addf %146, %147 : vector<14x128xf32>
    %c2_77 = arith.constant 2 : index
    %c0_78 = arith.constant 0 : index
    %149 = vector.load %arg19[%c2_77, %c0_78] : memref<16x128xf32, #tpu.memory_space<vmem>>, vector<14x128xf32>
    tpu.vector_store %arg19[%c2_77, %c0_78], %148 {strides = array<i32>} : memref<16x128xf32, #tpu.memory_space<vmem>>, vector<14x128xf32>,
    %c4 = arith.constant 4 : index
    %c0_79 = arith.constant 0 : index
    %150 = vector.load %arg19[%c4, %c0_79] : memref<16x128xf32, #tpu.memory_space<vmem>>, vector<12x128xf32>
    %c0_80 = arith.constant 0 : index
    %c0_81 = arith.constant 0 : index
    %151 = vector.load %arg19[%c0_80, %c0_81] : memref<16x128xf32, #tpu.memory_space<vmem>>, vector<12x128xf32>
    %152 = arith.addf %150, %151 : vector<12x128xf32>
    %c4_82 = arith.constant 4 : index
    %c0_83 = arith.constant 0 : index
    %153 = vector.load %arg19[%c4_82, %c0_83] : memref<16x128xf32, #tpu.memory_space<vmem>>, vector<12x128xf32>
    tpu.vector_store %arg19[%c4_82, %c0_83], %152 {strides = array<i32>} : memref<16x128xf32, #tpu.memory_space<vmem>>, vector<12x128xf32>,
    %c8 = arith.constant 8 : index
    %c0_84 = arith.constant 0 : index
    %154 = vector.load %arg19[%c8, %c0_84] : memref<16x128xf32, #tpu.memory_space<vmem>>, vector<8x128xf32>
    %c0_85 = arith.constant 0 : index
    %c0_86 = arith.constant 0 : index
    %155 = vector.load %arg19[%c0_85, %c0_86] : memref<16x128xf32, #tpu.memory_space<vmem>>, vector<8x128xf32>
    %156 = arith.addf %154, %155 : vector<8x128xf32>
    %c8_87 = arith.constant 8 : index
    %c0_88 = arith.constant 0 : index
    %157 = vector.load %arg19[%c8_87, %c0_88] : memref<16x128xf32, #tpu.memory_space<vmem>>, vector<8x128xf32>
    tpu.vector_store %arg19[%c8_87, %c0_88], %156 {strides = array<i32>} : memref<16x128xf32, #tpu.memory_space<vmem>>, vector<8x128xf32>,
    %c0_89 = arith.constant 0 : index
    %c0_90 = arith.constant 0 : index
    %158 = vector.load %arg19[%c0_89, %c0_90] : memref<16x128xf32, #tpu.memory_space<vmem>>, vector<16x128xf32>
    %159 = arith.subf %140, %158 : vector<16x128xf32>
    %cst_91 = arith.constant dense<0xFF800000> : vector<128xf32>
    %160 = vector.multi_reduction <maximumf>, %159, %cst_91 [0] : vector<16x128xf32> to vector<128xf32>
    %161 = vector.shape_cast %160 : vector<128xf32> to vector<1x128xf32>
    %cst_92 = arith.constant -0.693147182 : f32
    %162 = vector.broadcast %cst_92 : f32 to vector<1x128xf32>
    %163 = arith.maximumf %161, %162 : vector<1x128xf32>
    %164 = vector.broadcast %163 : vector<1x128xf32> to vector<16x128xf32>
    %165 = arith.subf %159, %164 : vector<16x128xf32>
    %166 = math.exp %165 : vector<16x128xf32>
    %c0_93 = arith.constant 0 : index
    %c0_94 = arith.constant 0 : index
    %167 = vector.load %arg19[%c0_93, %c0_94] : memref<16x128xf32, #tpu.memory_space<vmem>>, vector<16x128xf32>
    tpu.vector_store %arg19[%c0_93, %c0_94], %166 {strides = array<i32>} : memref<16x128xf32, #tpu.memory_space<vmem>>, vector<16x128xf32>,
    %c1_95 = arith.constant 1 : index
    %c0_96 = arith.constant 0 : index
    %168 = vector.load %arg19[%c1_95, %c0_96] : memref<16x128xf32, #tpu.memory_space<vmem>>, vector<15x128xf32>
    %c0_97 = arith.constant 0 : index
    %c0_98 = arith.constant 0 : index
    %169 = vector.load %arg19[%c0_97, %c0_98] : memref<16x128xf32, #tpu.memory_space<vmem>>, vector<15x128xf32>
    %170 = arith.addf %168, %169 : vector<15x128xf32>
    %c1_99 = arith.constant 1 : index
    %c0_100 = arith.constant 0 : index
    %171 = vector.load %arg19[%c1_99, %c0_100] : memref<16x128xf32, #tpu.memory_space<vmem>>, vector<15x128xf32>
    tpu.vector_store %arg19[%c1_99, %c0_100], %170 {strides = array<i32>} : memref<16x128xf32, #tpu.memory_space<vmem>>, vector<15x128xf32>,
    %c2_101 = arith.constant 2 : index
    %c0_102 = arith.constant 0 : index
    %172 = vector.load %arg19[%c2_101, %c0_102] : memref<16x128xf32, #tpu.memory_space<vmem>>, vector<14x128xf32>
    %c0_103 = arith.constant 0 : index
    %c0_104 = arith.constant 0 : index
    %173 = vector.load %arg19[%c0_103, %c0_104] : memref<16x128xf32, #tpu.memory_space<vmem>>, vector<14x128xf32>
    %174 = arith.addf %172, %173 : vector<14x128xf32>
    %c2_105 = arith.constant 2 : index
    %c0_106 = arith.constant 0 : index
    %175 = vector.load %arg19[%c2_105, %c0_106] : memref<16x128xf32, #tpu.memory_space<vmem>>, vector<14x128xf32>
    tpu.vector_store %arg19[%c2_105, %c0_106], %174 {strides = array<i32>} : memref<16x128xf32, #tpu.memory_space<vmem>>, vector<14x128xf32>,
    %c4_107 = arith.constant 4 : index
    %c0_108 = arith.constant 0 : index
    %176 = vector.load %arg19[%c4_107, %c0_108] : memref<16x128xf32, #tpu.memory_space<vmem>>, vector<12x128xf32>
    %c0_109 = arith.constant 0 : index
    %c0_110 = arith.constant 0 : index
    %177 = vector.load %arg19[%c0_109, %c0_110] : memref<16x128xf32, #tpu.memory_space<vmem>>, vector<12x128xf32>
    %178 = arith.addf %176, %177 : vector<12x128xf32>
    %c4_111 = arith.constant 4 : index
    %c0_112 = arith.constant 0 : index
    %179 = vector.load %arg19[%c4_111, %c0_112] : memref<16x128xf32, #tpu.memory_space<vmem>>, vector<12x128xf32>
    tpu.vector_store %arg19[%c4_111, %c0_112], %178 {strides = array<i32>} : memref<16x128xf32, #tpu.memory_space<vmem>>, vector<12x128xf32>,
    %c8_113 = arith.constant 8 : index
    %c0_114 = arith.constant 0 : index
    %180 = vector.load %arg19[%c8_113, %c0_114] : memref<16x128xf32, #tpu.memory_space<vmem>>, vector<8x128xf32>
    %c0_115 = arith.constant 0 : index
    %c0_116 = arith.constant 0 : index
    %181 = vector.load %arg19[%c0_115, %c0_116] : memref<16x128xf32, #tpu.memory_space<vmem>>, vector<8x128xf32>
    %182 = arith.addf %180, %181 : vector<8x128xf32>
    %c8_117 = arith.constant 8 : index
    %c0_118 = arith.constant 0 : index
    %183 = vector.load %arg19[%c8_117, %c0_118] : memref<16x128xf32, #tpu.memory_space<vmem>>, vector<8x128xf32>
    tpu.vector_store %arg19[%c8_117, %c0_118], %182 {strides = array<i32>} : memref<16x128xf32, #tpu.memory_space<vmem>>, vector<8x128xf32>,
    %c0_119 = arith.constant 0 : index
    %c0_120 = arith.constant 0 : index
    %184 = vector.load %arg19[%c0_119, %c0_120] : memref<16x128xf32, #tpu.memory_space<vmem>>, vector<16x128xf32>
    %185 = vector.broadcast %163 : vector<1x128xf32> to vector<16x128xf32>
    %186 = arith.addf %158, %185 : vector<16x128xf32>
    %cst_121 = arith.constant -0.693147182 : f32
    %187 = vector.broadcast %cst_121 : f32 to vector<1x128xf32>
    %188 = arith.subf %187, %163 : vector<1x128xf32>
    %189 = math.exp %188 : vector<1x128xf32>
    %190 = vector.broadcast %189 : vector<1x128xf32> to vector<16x128xf32>
    %191 = arith.addf %190, %184 : vector<16x128xf32>
    %192 = math.log %191 : vector<16x128xf32>
    %193 = arith.addf %186, %192 : vector<16x128xf32>
    %194 = math.exp %193 : vector<16x128xf32>
    %195 = arith.addf %194, %57 : vector<16x128xf32>
    %c0_122 = arith.constant 0 : index
    %c0_123 = arith.constant 0 : index
    %196 = vector.load %arg12[%c0_122, %c0_123] : memref<1x128xf32, #tpu.memory_space<vmem>>, vector<1x128xf32>
    %c0_124 = arith.constant 0 : index
    %c0_125 = arith.constant 0 : index
    %197 = vector.load %arg13[%c0_124, %c0_125] : memref<1x128xf32, #tpu.memory_space<vmem>>, vector<1x128xf32>
    %cst_126 = arith.constant dense<0.000000e+00> : vector<16xf32>
    %198 = vector.multi_reduction <add>, %195, %cst_126 [1] : vector<16x128xf32> to vector<16xf32>
    %199 = vector.shape_cast %198 : vector<16xf32> to vector<16x1xf32>
    %cst_127 = arith.constant 1.280000e+02 : f32
    %200 = vector.broadcast %cst_127 : f32 to vector<16x1xf32>
    %201 = arith.divf %199, %200 : vector<16x1xf32>
    %202 = vector.broadcast %201 : vector<16x1xf32> to vector<16x128xf32>
    %203 = arith.subf %195, %202 : vector<16x128xf32>
    %204 = arith.mulf %203, %203 : vector<16x128xf32>
    %cst_128 = arith.constant dense<0.000000e+00> : vector<16xf32>
    %205 = vector.multi_reduction <add>, %204, %cst_128 [1] : vector<16x128xf32> to vector<16xf32>
    %206 = vector.shape_cast %205 : vector<16xf32> to vector<16x1xf32>
    %cst_129 = arith.constant 1.280000e+02 : f32
    %207 = vector.broadcast %cst_129 : f32 to vector<16x1xf32>
    %208 = arith.divf %206, %207 : vector<16x1xf32>
    %cst_130 = arith.constant 9.99999974E-6 : f32
    %209 = vector.broadcast %cst_130 : f32 to vector<16x1xf32>
    %210 = arith.addf %208, %209 : vector<16x1xf32>
    %211 = math.rsqrt %210 : vector<16x1xf32>
    %212 = vector.broadcast %211 : vector<16x1xf32> to vector<16x128xf32>
    %213 = arith.mulf %203, %212 : vector<16x128xf32>
    %214 = vector.broadcast %196 : vector<1x128xf32> to vector<16x128xf32>
    %215 = arith.mulf %213, %214 : vector<16x128xf32>
    %216 = vector.broadcast %197 : vector<1x128xf32> to vector<16x128xf32>
    %217 = arith.addf %215, %216 : vector<16x128xf32>
    %c0_131 = arith.constant 0 : index
    %c0_132 = arith.constant 0 : index
    %218 = vector.load %arg14[%c0_131, %c0_132] : memref<128x512xf32, #tpu.memory_space<vmem>>, vector<128x512xf32>
    %c0_133 = arith.constant 0 : index
    %c0_134 = arith.constant 0 : index
    %219 = vector.load %arg15[%c0_133, %c0_134] : memref<1x512xf32, #tpu.memory_space<vmem>>, vector<1x512xf32>
    %220 = arith.truncf %217 : vector<16x128xf32> to vector<16x128xbf16>
    %221 = arith.truncf %218 : vector<128x512xf32> to vector<128x512xbf16>
    %cst_135 = arith.constant dense<0.000000e+00> : vector<16x512xf32>
    %222 = tpu.matmul %220, %221, %cst_135 {dimension_numbers = #tpu.dot_dimension_numbers<[1], [0], [0], [1], [0, 0, 1, 1], [], []>} : vector<16x128xbf16>, vector<128x512xbf16>, vector<16x512xf32> -> vector<16x512xf32>
    %223 = vector.broadcast %219 : vector<1x512xf32> to vector<16x512xf32>
    %224 = arith.addf %222, %223 : vector<16x512xf32>
    %cst_136 = arith.constant 5.000000e-01 : f32
    %225 = vector.broadcast %cst_136 : f32 to vector<16x512xf32>
    %226 = arith.mulf %225, %224 : vector<16x512xf32>
    %cst_137 = arith.constant 0.707106769 : f32
    %227 = vector.broadcast %cst_137 : f32 to vector<16x512xf32>
    %228 = arith.mulf %224, %227 : vector<16x512xf32>
    %229 = math.erf %228 : vector<16x512xf32>
    %cst_138 = arith.constant 1.000000e+00 : f32
    %230 = vector.broadcast %cst_138 : f32 to vector<16x512xf32>
    %231 = arith.addf %230, %229 : vector<16x512xf32>
    %232 = arith.mulf %226, %231 : vector<16x512xf32>
    %c0_139 = arith.constant 0 : index
    %c0_140 = arith.constant 0 : index
    %233 = vector.load %arg16[%c0_139, %c0_140] : memref<512x128xf32, #tpu.memory_space<vmem>>, vector<512x128xf32>
    %c0_141 = arith.constant 0 : index
    %c0_142 = arith.constant 0 : index
    %234 = vector.load %arg17[%c0_141, %c0_142] : memref<1x128xf32, #tpu.memory_space<vmem>>, vector<1x128xf32>
    %235 = arith.truncf %232 : vector<16x512xf32> to vector<16x512xbf16>
    %236 = arith.truncf %233 : vector<512x128xf32> to vector<512x128xbf16>
    %cst_143 = arith.constant dense<0.000000e+00> : vector<16x128xf32>
    %237 = tpu.matmul %235, %236, %cst_143 {dimension_numbers = #tpu.dot_dimension_numbers<[1], [0], [0], [1], [0, 0, 1, 1], [], []>} : vector<16x512xbf16>, vector<512x128xbf16>, vector<16x128xf32> -> vector<16x128xf32>
    %238 = vector.broadcast %234 : vector<1x128xf32> to vector<16x128xf32>
    %239 = arith.addf %237, %238 : vector<16x128xf32>
    %240 = arith.addf %239, %195 : vector<16x128xf32>
    %c0_144 = arith.constant 0 : index
    %c0_145 = arith.constant 0 : index
    %c0_146 = arith.constant 0 : index
    %241 = vector.load %arg18[%c0_144, %c0_145, %c0_146] : memref<1x16x128xf32, #tpu.memory_space<vmem>>, vector<1x16x128xf32>
    %242 = vector.shape_cast %241 : vector<1x16x128xf32> to vector<16x128xf32>
    %243 = vector.shape_cast %240 : vector<16x128xf32> to vector<1x16x128xf32>
    tpu.vector_store %arg18[%c0_144, %c0_145, %c0_146], %243 {strides = array<i32>} : memref<1x16x128xf32, #tpu.memory_space<vmem>>, vector<1x16x128xf32>,
    return
  }
  func.func @transform_0(%arg0: i32) -> (i32, i32, i32) {
    %c0_i32 = arith.constant 0 : i32
    %c0_i32_0 = arith.constant 0 : i32
    %c0_i32_1 = arith.constant 0 : i32
    return %arg0, %c0_i32, %c0_i32_0 : i32, i32, i32
  }
  func.func @transform_1(%arg0: i32) -> (i32, i32) {
    %c0_i32 = arith.constant 0 : i32
    %c0_i32_0 = arith.constant 0 : i32
    %c0_i32_1 = arith.constant 0 : i32
    return %c0_i32, %c0_i32_0 : i32, i32
  }
  func.func @transform_2(%arg0: i32) -> (i32, i32) {
    %c0_i32 = arith.constant 0 : i32
    %c0_i32_0 = arith.constant 0 : i32
    %c0_i32_1 = arith.constant 0 : i32
    return %c0_i32, %c0_i32_0 : i32, i32
  }
  func.func @transform_3(%arg0: i32) -> (i32, i32) {
    %c0_i32 = arith.constant 0 : i32
    %c0_i32_0 = arith.constant 0 : i32
    %c0_i32_1 = arith.constant 0 : i32
    return %c0_i32, %c0_i32_0 : i32, i32
  }
  func.func @transform_4(%arg0: i32) -> (i32, i32) {
    %c0_i32 = arith.constant 0 : i32
    %c0_i32_0 = arith.constant 0 : i32
    %c0_i32_1 = arith.constant 0 : i32
    return %c0_i32, %c0_i32_0 : i32, i32
  }
  func.func @transform_5(%arg0: i32) -> (i32, i32) {
    %c0_i32 = arith.constant 0 : i32
    %c0_i32_0 = arith.constant 0 : i32
    %c0_i32_1 = arith.constant 0 : i32
    return %c0_i32, %c0_i32_0 : i32, i32
  }
  func.func @transform_6(%arg0: i32) -> (i32, i32) {
    %c0_i32 = arith.constant 0 : i32
    %c0_i32_0 = arith.constant 0 : i32
    %c0_i32_1 = arith.constant 0 : i32
    return %c0_i32, %c0_i32_0 : i32, i32
  }
  func.func @transform_7(%arg0: i32) -> (i32, i32) {
    %c0_i32 = arith.constant 0 : i32
    %c0_i32_0 = arith.constant 0 : i32
    %c0_i32_1 = arith.constant 0 : i32
    return %c0_i32, %c0_i32_0 : i32, i32
  }
  func.func @transform_8(%arg0: i32) -> (i32, i32) {
    %c0_i32 = arith.constant 0 : i32
    %c0_i32_0 = arith.constant 0 : i32
    %c0_i32_1 = arith.constant 0 : i32
    return %c0_i32, %c0_i32_0 : i32, i32
  }
  func.func @transform_9(%arg0: i32) -> (i32, i32) {
    %c0_i32 = arith.constant 0 : i32
    %c0_i32_0 = arith.constant 0 : i32
    %c0_i32_1 = arith.constant 0 : i32
    return %c0_i32, %c0_i32_0 : i32, i32
  }
  func.func @transform_10(%arg0: i32) -> (i32, i32) {
    %c0_i32 = arith.constant 0 : i32
    %c0_i32_0 = arith.constant 0 : i32
    %c0_i32_1 = arith.constant 0 : i32
    return %c0_i32, %c0_i32_0 : i32, i32
  }
  func.func @transform_11(%arg0: i32) -> (i32, i32) {
    %c0_i32 = arith.constant 0 : i32
    %c0_i32_0 = arith.constant 0 : i32
    %c0_i32_1 = arith.constant 0 : i32
    return %c0_i32, %c0_i32_0 : i32, i32
  }
  func.func @transform_12(%arg0: i32) -> (i32, i32) {
    %c0_i32 = arith.constant 0 : i32
    %c0_i32_0 = arith.constant 0 : i32
    %c0_i32_1 = arith.constant 0 : i32
    return %c0_i32, %c0_i32_0 : i32, i32
  }
  func.func @transform_13(%arg0: i32) -> (i32, i32) {
    %c0_i32 = arith.constant 0 : i32
    %c0_i32_0 = arith.constant 0 : i32
    %c0_i32_1 = arith.constant 0 : i32
    return %c0_i32, %c0_i32_0 : i32, i32
  }
  func.func @transform_14(%arg0: i32) -> (i32, i32) {
    %c0_i32 = arith.constant 0 : i32
    %c0_i32_0 = arith.constant 0 : i32
    %c0_i32_1 = arith.constant 0 : i32
    return %c0_i32, %c0_i32_0 : i32, i32
  }
  func.func @transform_15(%arg0: i32) -> (i32, i32) {
    %c0_i32 = arith.constant 0 : i32
    %c0_i32_0 = arith.constant 0 : i32
    %c0_i32_1 = arith.constant 0 : i32
    return %c0_i32, %c0_i32_0 : i32, i32
  }
  func.func @transform_16(%arg0: i32) -> (i32, i32) {
    %c0_i32 = arith.constant 0 : i32
    %c0_i32_0 = arith.constant 0 : i32
    %c0_i32_1 = arith.constant 0 : i32
    return %c0_i32, %c0_i32_0 : i32, i32
  }
  func.func @transform_17(%arg0: i32) -> (i32, i32, i32) {
    %c0_i32 = arith.constant 0 : i32
    %c0_i32_0 = arith.constant 0 : i32
    %c0_i32_1 = arith.constant 0 : i32
    return %arg0, %c0_i32, %c0_i32_0 : i32, i32, i32
  }
}

</mosaic_0001>

<bundles_post_ra>
// kernel: tpu_custom_call.1
= control target key start
LH: loop header
LB: loop body
LE: loop exit
PB: predicated region body
PF: predicated region fallthrough
CT: control target
= control target key end

     0   :  { %s3047_s0 = inlined_call_operand.hbm [shape: f32[4,16,128], index: 0, kind: input, shape index: {}]   ;;  %s3048_s1 = inlined_call_operand.hbm [shape: f32[1,128], index: 1, kind: input, shape index: {}]   ;;  %s3049_s2 = inlined_call_operand.hbm [shape: f32[1,128], index: 2, kind: input, shape index: {}]   ;;  %s3050_s3 = inlined_call_operand.vmem [shape: f32[3,128], index: 3, kind: input, shape index: {}]   ;;  %s3051_s4 = inlined_call_operand.vmem [shape: f32[1,128], index: 4, kind: input, shape index: {}]   ;;  %s3052_s5 = inlined_call_operand.hbm [shape: f32[128,128], index: 5, kind: input, shape index: {}]   ;;  %s3053_s6 = inlined_call_operand.vmem [shape: f32[1,128], index: 6, kind: input, shape index: {}]   ;;  %s3054_s7 = inlined_call_operand.vmem [shape: f32[1,128], index: 7, kind: input, shape index: {}]   ;;  %s3055_s8 = inlined_call_operand.vmem [shape: f32[1,128], index: 8, kind: input, shape index: {}]   ;;  %s3056_s9 = inlined_call_operand.hbm [shape: f32[128,384], index: 9, kind: input, shape index: {}]   ;;  %s3057_s10 = inlined_call_operand.vmem [shape: f32[1,384], index: 10, kind: input, shape index: {}]   ;;  %s3058_s11 = inlined_call_operand.vmem [shape: f32[1,128], index: 11, kind: input, shape index: {}]   ;;  %s3059_s12 = inlined_call_operand.vmem [shape: f32[1,128], index: 12, kind: input, shape index: {}]   ;;  %s3060_s13 = inlined_call_operand.hbm [shape: f32[128,512], index: 13, kind: input, shape index: {}]   ;;  %s3061_s14 = inlined_call_operand.vmem [shape: f32[1,512], index: 14, kind: input, shape index: {}]   ;;  %s3062_s15 = inlined_call_operand.hbm [shape: f32[512,128], index: 15, kind: input, shape index: {}]   ;;  %s3063_s16 = inlined_call_operand.vmem [shape: f32[1,128], index: 16, kind: input, shape index: {}]   ;;  %s3064_s17 = inlined_call_operand.hbm [shape: f32[4,16,128], index: 17, kind: output, shape index: {}]  }
   0x1   :  { %3076 = sst [smem:[#allocation21_spill]] %s3047_s0 }
   0x2   :  { %3077 = sst [smem:[#allocation22_spill]] %s3048_s1 }
   0x3   :  { %3078 = sst [smem:[#allocation23_spill]] %s3049_s2 }
   0x4   :  { %3079 = sst [smem:[#allocation24_spill]] %s3052_s5 }
   0x5   :  { %3080 = sst [smem:[#allocation25_spill]] %s3054_s7 }
   0x6   :  { %3081 = sst [smem:[#allocation26_spill]] %s3055_s8 }
   0x7   :  { %3082 = sst [smem:[#allocation27_spill]] %s3057_s10 }
   0x8   :  { %3083 = sst [smem:[#allocation28_spill]] %s3058_s11 }
   0x9   :  { %3084 = sst [smem:[#allocation29_spill]] %s3059_s12 }
   0xa   :  { %3085 = sst [smem:[#allocation30_spill]] %s3061_s14 }
   0xb   :  { %3086 = sst [smem:[#allocation31_spill]] %s3063_s16 }
   0xc   :  { %3087 = sst [smem:[#allocation32_spill]] %s3064_s17 }
   0xd   :  { %22 = vsyncpa [#allocation4], 0 }
   0xe   :  { %24 = vsyncpa [#allocation4 + $0x1], 0 }
   0xf   :  { %25 = vsyncpa [#allocation7], 0 }
  0x10   :  { %26 = vsyncpa [#allocation10], 0 }
  0x11   :  { %27 = vsyncpa [#allocation13], 0 }
  0x12   :  { %28 = vsyncpa [#allocation5], 0 }
  0x13   :  { %30 = vsyncpa [#allocation5 + $0x1], 0  ;;  %s2546_s24 = smov 0   ;;  %s2548_s25 = smov 0  }
  0x14   :  { %s2550_s26 = smov 0   ;;  %s2552_s27 = smov 0  }
  0x15 LB: > { %s2437_s28 = smov [#allocation6]   ;;  %s2567_s0 = sadd.s32 4294967295, %s2435_s27   ;;  %s2435_s27 = sphi %s2552_s27, %s3123_s27   ;;  %s2431_s26 = sphi %s2550_s26, %s3122_s26   ;;  %s2427_s25 = sphi %s2548_s25, %s3121_s25   ;;  %s2423_s24 = sphi %s2546_s24, %s3120_s24  }
  0x16   : > { %s442_s29 = sshll.u32 %s2437_s28, 4  ;;  %p1833_p0 = scmp.ge.s32.totalorder %s2435_s27, 1  ;;  %s443_s29 = int_to_ptr.vmem [resolvable:$true] %s442_s29 }
  0x17   : > { %p3068_p1 = scmp.eq.s32.totalorder %s2567_s0, 0  ;;  %p429_p2 = scmp.lt.s32.totalorder %s2435_s27, 5 }
  0x18   : > { %s2438_s18 = smov [#allocation9]   ;;  %s2439_s20 = smov [#allocation12]  }
  0x19   : > { %p2572_p3 = pnand %p1833_p0, %p429_p2  ;;  %s469_s19 = sshll.u32 %s2438_s18, 4  ;;  %s2578_s19 = int_to_ptr.vmem [resolvable:$true] %s469_s19 }
  0x1a   : > { %s513_s21 = sshll.u32 %s2439_s20, 4  ;;  %s3090_s28 = sld [smem:[#allocation22_spill]]  ;;  %s2586_s21 = int_to_ptr.vmem [resolvable:$true] %s513_s21 }
  0x1b   : > { %s3088_s30 = scalar_select %p2572_p3, 1, 0 }
  0x1c   : > { %p1999_p4 = pneg %p2572_p3 }
  0x1e   : > { %p2582_p5 = pnand %p1999_p4, %p3068_p1 }
  0x20   : > { %s2159_s17 = scalar_lea.hbm %s3090_s28, 16  ;;  %p2596_p7 = pneg %p2582_p5 }
  0x21   : > { %p2160_p6 = scmp.ne.s32.totalorder %s3090_s28, %s2159_s17  ;;  %p2166_p10 = scmp.lt.u32.totalorder %s2159_s17, %s3090_s28 }
  0x23   : > { %p2162_p8 = pnand %p2596_p7, %p2160_p6 }
  0x25   : > { %p2163_p9 = pneg %p2162_p8 }
  0x27   : > { %p2168_p11 = pnand %p2166_p10, %p2163_p9 }
  0x29   : > { %2171 = shalt.err (!%p2168_p11)
}
  0x2a   : > { %s2172_s22 = scalar_lea.vmem %s443_s29, 16  ;;  %s2179_s14 = scalar_lea.vmem %s443_s29, 32 }
  0x2b   : > { %p2173_p12 = scmp.ne.s32.totalorder %s443_s29, %s2172_s22  ;;  %p2180_p2 = scmp.lt.s32.totalorder %s443_s29, %s443_s29 }
  0x2c   : > { %p2181_p4 = scmp.lt.s32.totalorder %s2179_s14, %s2172_s22 }
  0x2d   : > { %p2175_p13 = pnand %p2173_p12, %p2596_p7 }
  0x2e   : > { %p2182_p1 = por %p2181_p4, %p2180_p2 }
  0x2f   : > { %p2176_p0 = pneg %p2175_p13 }
  0x31   : > { %p2183_p3 = pnand %p2182_p1, %p2176_p0 }
  0x33   : > { %2186 = shalt.err (!%p2183_p3)
}
  0x34   : > { %2002 = dma.hbm_to_vmem [thread:$0]  (!%p2582_p5), %s3090_s28, 16, %s443_s29, [#allocation7]  }
  0x35   : > { %s3092_s5 = sld [smem:[#allocation24_spill]] }
  0x3b   : > { %s2187_s20 = scalar_lea.hbm %s3092_s5, 2048 }
  0x3c   : > { %p2188_p6 = scmp.ne.s32.totalorder %s3092_s5, %s2187_s20  ;;  %p2194_p1 = scmp.lt.u32.totalorder %s2187_s20, %s3092_s5 }
  0x3e   : > { %p2190_p8 = pnand %p2188_p6, %p2596_p7 }
  0x40   : > { %p2191_p9 = pneg %p2190_p8 }
  0x42   : > { %p2196_p3 = pnand %p2194_p1, %p2191_p9 }
  0x44   : > { %2199 = shalt.err (!%p2196_p3)
}
  0x45   : > { %s2200_s29 = scalar_lea.vmem %s2578_s19, 2048  ;;  %p2208_p13 = scmp.lt.s32.totalorder %s2578_s19, %s2578_s19 }
  0x46   : > { %p2201_p10 = scmp.ne.s32.totalorder %s2578_s19, %s2200_s29  ;;  %p2209_p0 = scmp.lt.s32.totalorder %s2200_s29, %s2200_s29 }
  0x48   : > { %p2203_p11 = pnand %p2201_p10, %p2596_p7  ;;  %p2210_p2 = por %p2209_p0, %p2208_p13 }
  0x4a   : > { %p2204_p12 = pneg %p2203_p11 }
  0x4c   : > { %p2211_p4 = pnand %p2210_p2, %p2204_p12 }
  0x4e   : > { %2214 = shalt.err (!%p2211_p4)
}
  0x4f   : > { %s3071_s10 = smov 128   ;;  %s3073_s11 = smov 8  }
  0x50   : > { %2008 = dma.hbm_to_vmem [thread:$0]  (!%p2582_p5), %s3092_s5, 2048, %s2578_s19, [#allocation10], %s3071_s10, %s3071_s10, %s3073_s11  }
  0x51   : > { %s2215_s20 = scalar_lea.hbm %s3060_s13, 8192 }
  0x52   : > { %p2216_p6 = scmp.ne.s32.totalorder %s3060_s13, %s2215_s20  ;;  %p2222_p1 = scmp.lt.u32.totalorder %s2215_s20, %s3060_s13 }
  0x54   : > { %p2218_p8 = pnand %p2216_p6, %p2596_p7 }
  0x56   : > { %p2219_p9 = pneg %p2218_p8 }
  0x58   : > { %p2224_p3 = pnand %p2222_p1, %p2219_p9 }
  0x5a   : > { %2227 = shalt.err (!%p2224_p3)
}
  0x5b   : > { %s2228_s19 = scalar_lea.vmem %s2586_s21, 8192  ;;  %p2236_p13 = scmp.lt.s32.totalorder %s2586_s21, %s2586_s21 }
  0x5c   : > { %p2229_p10 = scmp.ne.s32.totalorder %s2586_s21, %s2228_s19  ;;  %p2237_p0 = scmp.lt.s32.totalorder %s2228_s19, %s2228_s19 }
  0x5e   : > { %p2231_p11 = pnand %p2229_p10, %p2596_p7  ;;  %p2238_p2 = por %p2237_p0, %p2236_p13 }
  0x60   : > { %p2232_p12 = pneg %p2231_p11 }
  0x62   : > { %p2239_p4 = pnand %p2238_p2, %p2232_p12 }
  0x64   : > { %2242 = shalt.err (!%p2239_p4)
}
  0x65   : > { %s2442_s16 = smov 512   ;;  %s2443_s28 = smov 32  }
  0x66   : > { %2014 = dma.hbm_to_vmem [thread:$0]  (!%p2582_p5), %s3060_s13, 8192, %s2586_s21, [#allocation13], %s2442_s16, %s2442_s16, %s2443_s28  }
  0x67   : > { %s2444_s17 = smov [#allocation8]   ;;  %s2445_s22 = smov [#allocation11]  }
  0x68   : > { %s453_s20 = sshll.u32 %s2444_s17, 4  ;;  %s491_s14 = sshll.u32 %s2445_s22, 4  ;;  %s454_s20 = int_to_ptr.vmem [resolvable:$true] %s453_s20  ;;  %s492_s14 = int_to_ptr.vmem [resolvable:$true] %s491_s14 }
  0x69   : > { %s3093_s2 = sld [smem:[#allocation23_spill]] }
  0x6f   : > { %s2243_s10 = scalar_lea.hbm %s3093_s2, 16 }
  0x70   : > { %p2244_p6 = scmp.ne.s32.totalorder %s3093_s2, %s2243_s10  ;;  %p2250_p1 = scmp.lt.u32.totalorder %s2243_s10, %s3093_s2 }
  0x72   : > { %p2246_p8 = pnand %p2244_p6, %p2596_p7 }
  0x74   : > { %p2247_p9 = pneg %p2246_p8 }
  0x76   : > { %p2252_p3 = pnand %p2250_p1, %p2247_p9 }
  0x78   : > { %2255 = shalt.err (!%p2252_p3)
}
  0x79   : > { %s2256_s21 = scalar_lea.vmem %s454_s20, 16  ;;  %s2263_s16 = scalar_lea.vmem %s454_s20, 32 }
  0x7a   : > { %p2257_p10 = scmp.ne.s32.totalorder %s454_s20, %s2256_s21  ;;  %p2264_p13 = scmp.lt.s32.totalorder %s454_s20, %s454_s20 }
  0x7b   : > { %p2265_p0 = scmp.lt.s32.totalorder %s2263_s16, %s2256_s21 }
  0x7c   : > { %p2259_p11 = pnand %p2257_p10, %p2596_p7 }
  0x7d   : > { %p2266_p2 = por %p2265_p0, %p2264_p13 }
  0x7e   : > { %p2260_p12 = pneg %p2259_p11 }
  0x80   : > { %p2267_p4 = pnand %p2266_p2, %p2260_p12 }
  0x82   : > { %2270 = shalt.err (!%p2267_p4)
}
  0x83   : > { %2005 = dma.hbm_to_vmem [thread:$0]  (!%p2582_p5), %s3093_s2, 16, %s454_s20, [#allocation7]  }
  0x84   : > { %s2271_s10 = scalar_lea.hbm %s3056_s9, 6144 }
  0x85   : > { %p2272_p6 = scmp.ne.s32.totalorder %s3056_s9, %s2271_s10  ;;  %p2278_p1 = scmp.lt.u32.totalorder %s2271_s10, %s3056_s9 }
  0x87   : > { %p2274_p8 = pnand %p2272_p6, %p2596_p7 }
  0x89   : > { %p2275_p9 = pneg %p2274_p8 }
  0x8b   : > { %p2280_p3 = pnand %p2278_p1, %p2275_p9 }
  0x8d   : > { %2283 = shalt.err (!%p2280_p3)
}
  0x8e   : > { %s2284_s22 = scalar_lea.vmem %s492_s14, 6144  ;;  %p2292_p13 = scmp.lt.s32.totalorder %s492_s14, %s492_s14 }
  0x8f   : > { %p2285_p10 = scmp.ne.s32.totalorder %s492_s14, %s2284_s22  ;;  %p2293_p0 = scmp.lt.s32.totalorder %s2284_s22, %s2284_s22 }
  0x91   : > { %p2287_p11 = pnand %p2285_p10, %p2596_p7  ;;  %p2294_p2 = por %p2293_p0, %p2292_p13 }
  0x93   : > { %p2288_p12 = pneg %p2287_p11 }
  0x95   : > { %p2295_p4 = pnand %p2294_p2, %p2288_p12 }
  0x97   : > { %2298 = shalt.err (!%p2295_p4)
}
  0x98   : > { %s2446_s20 = smov 384   ;;  %s2447_s29 = smov 24  }
  0x99   : > { %2011 = dma.hbm_to_vmem [thread:$0]  (!%p2582_p5), %s3056_s9, 6144, %s492_s14, [#allocation10], %s2446_s20, %s2446_s20, %s2447_s29  }
  0x9a   : > { %s2448_s16 = smov [#allocation14]   ;;  %s2299_s8 = scalar_lea.hbm %s3062_s15, 8192 }
  0x9b   : > { %s529_s5 = sshll.u32 %s2448_s16, 4  ;;  %p2300_p6 = scmp.ne.s32.totalorder %s3062_s15, %s2299_s8  ;;  %s530_s5 = int_to_ptr.vmem [resolvable:$true] %s529_s5 }
  0x9c   : > { %p2306_p1 = scmp.lt.u32.totalorder %s2299_s8, %s3062_s15 }
  0x9d   : > { %p2302_p8 = pnand %p2300_p6, %p2596_p7 }
  0x9f   : > { %p2303_p9 = pneg %p2302_p8 }
  0xa1   : > { %p2308_p3 = pnand %p2306_p1, %p2303_p9 }
  0xa3   : > { %2311 = shalt.err (!%p2308_p3)
}
  0xa4   : > { %s2312_s14 = scalar_lea.vmem %s530_s5, 8192  ;;  %p2320_p13 = scmp.lt.s32.totalorder %s530_s5, %s530_s5 }
  0xa5   : > { %p2313_p10 = scmp.ne.s32.totalorder %s530_s5, %s2312_s14  ;;  %p2321_p0 = scmp.lt.s32.totalorder %s2312_s14, %s2312_s14 }
  0xa7   : > { %p2315_p11 = pnand %p2313_p10, %p2596_p7  ;;  %p2322_p2 = por %p2321_p0, %p2320_p13 }
  0xa9   : > { %p2316_p12 = pneg %p2315_p11 }
  0xab   : > { %p2323_p4 = pnand %p2322_p2, %p2316_p12 }
  0xad   : > { %2326 = shalt.err (!%p2323_p4)
}
  0xae   : > { %s3094_s17 = smov 8   ;;  %s3095_s22 = smov 128  }
  0xaf   : > { %2017 = dma.hbm_to_vmem [thread:$0]  (!%p2582_p5), %s3062_s15, 8192, %s530_s5, [#allocation13], %s3095_s22, %s3095_s22, %s3094_s17  }
  0xb0   : > { %s1832_s1 = sadd.s32 4294967294, %s2435_s27   ;;  %s2720_s18 = sadd.s32 1, %s2435_s27  }
  0xb1   : > { %s40_s19 = ssub.s32 %s2435_s27, %s2720_s18  ;;  %s43_s21 = sadd.s32 1, %s2431_s26 }
  0xb2   : > { %p41_p7 = scmp.eq.s32.totalorder %s40_s19, 0  ;;  %p50_p6 = scmp.ne.s32.totalorder %s2431_s26, %s2427_s25 }
  0xb3   : > { %p51_p8 = scmp.eq.s32.totalorder %s2435_s27, 0  ;;  %p56_p9 = scmp.ne.s32.totalorder %s2427_s25, %s2423_s24 }
  0xb4   : > { %s2731_s16 = scalar_select %p41_p7, %s2431_s26, %s43_s21  }
  0xb5   : > { %p2733_p1 = por %p51_p8, %p50_p6  ;;  %p3097_p3 = scmp.eq.s32.totalorder %s2567_s0, 0 }
  0xb6   : > { %p416_p10 = scmp.eq.s32.totalorder %s2567_s0, 3  ;;  %p422_p11 = scmp.eq.s32.totalorder %s1832_s1, 3 }
  0xb7   : > { %p2739_p5 = por %p3097_p3, %p56_p9  ;;  %p2032_p12 = scmp.lt.s32.totalorder %s2435_s27, 4 }
  0xb8   : > { %s546_s7 = sand.u32 1, %s2431_s26   ;;  %p2746_p13 = por %p416_p10, %p50_p6 }
  0xb9   : > { %p2750_p0 = por %p422_p11, %p56_p9  ;;  %s1841_s28 = sshll.u32 %s546_s7, 4 }
  0xba   : > { %s3099_s8 = scalar_select %p2746_p13, 1, 0 }
  0xbb   : > { %s3100_s10 = scalar_select %p2750_p0, 1, 0 }
  0xbc   : > { %s1867_s23 = sshll.u32 %s2435_s27, 8  ;;  %s3101_s20 = sld [smem:[#allocation21_spill]] }
  0xbd   : > { %s550_s1 = scalar_lea.vmem [#allocation3], %s1841_s28  ;;  %p2764_p2 = pnand %p2032_p12, %p2733_p1 }
  0xbe   : > { %s557_s19 = sshll.u32 %s550_s1, 4  ;;  %s2768_s2 = scalar_lea.sflag [#allocation4], %s546_s7  ;;  %s2760_s19 = int_to_ptr.vmem [resolvable:$true] %s557_s19 }
  0xbf   : > { %p2329_p7 = pneg %p2764_p2 }
  0xc2   : > { %s2758_s29 = scalar_lea.hbm %s3101_s20, %s1867_s23  ;;  %s2332_s11 = scalar_lea.hbm %s3101_s20, 1024 }
  0xc3   : > { %s2327_s12 = scalar_lea.hbm %s2758_s29, 256  ;;  %p2333_p9 = scmp.lt.u32.totalorder %s2758_s29, %s3101_s20 }
  0xc4   : > { %p2328_p4 = scmp.ne.s32.totalorder %s2758_s29, %s2327_s12  ;;  %p2334_p1 = scmp.lt.u32.totalorder %s2332_s11, %s2327_s12 }
  0xc5   : > { %p2336_p10 = scmp.lt.u32.totalorder %s2327_s12, %s2758_s29 }
  0xc6   : > { %p2330_p6 = pnand %p2329_p7, %p2328_p4  ;;  %p2335_p3 = por %p2334_p1, %p2333_p9 }
  0xc8   : > { %p2331_p8 = pneg %p2330_p6  ;;  %p2337_p11 = por %p2336_p10, %p2335_p3 }
  0xca   : > { %p2338_p12 = pnand %p2337_p11, %p2331_p8 }
  0xcc   : > { %2341 = shalt.err (!%p2338_p12)
}
  0xcd   : > { %s2342_s7 = scalar_lea.vmem %s2760_s19, 256  ;;  %s2449_s28 = smov [#allocation3]  }
  0xce   : > { %p2343_p4 = scmp.ne.s32.totalorder %s2760_s19, %s2342_s7  ;;  %s2347_s23 = sshll.u32 %s2449_s28, 4  ;;  %s2348_s23 = int_to_ptr.vmem [resolvable:$false] %s2347_s23 }
  0xcf   : > { %s2349_s14 = scalar_lea.vmem %s2348_s23, 512  ;;  %p2350_p13 = scmp.lt.s32.totalorder %s2760_s19, %s2348_s23 }
  0xd0   : > { %p2345_p6 = pnand %p2343_p4, %p2329_p7  ;;  %p2351_p9 = scmp.lt.s32.totalorder %s2349_s14, %s2342_s7 }
  0xd2   : > { %p2346_p0 = pneg %p2345_p6  ;;  %p2352_p1 = por %p2351_p9, %p2350_p13 }
  0xd4   : > { %p2353_p3 = pnand %p2352_p1, %p2346_p0 }
  0xd6   : > { %2356 = shalt.err (!%p2353_p3)
}
  0xd7   : > { %2021 = dma.hbm_to_vmem [thread:$0]  (!%p2764_p2), %s2758_s29, 256, %s2760_s19, %s2768_s2, %s3095_s22, %s3095_s22, %s3094_s17  }
  0xd8   : > { %p3103_p7 = scmp.ne.s32.totalorder %s3088_s30, 0 }
  0xd9   : > { %s2802_s12 = sand.u32 (!%p3103_p7), 1, %s2427_s25  }
  0xda   : > { %569 = sbr.rel (%p3103_p7) target bundleno = 2307 (0x903), region = 88  ;;  %s1845_s11 = sshll.u32 (!%p3103_p7), %s2802_s12, 4 }
  0xdb   : > { %s572_s1 = scalar_lea.sflag (!%p3103_p7), [#allocation4], %s2802_s12  ;;  %s575_s21 = scalar_lea.vmem (!%p3103_p7), [#allocation3], %s1845_s11 }
  0xe1   : > { %2402 = dma.done.wait (%p2739_p5), %s572_s1, 256  }
  0xe2   : > { %2404 = vsyncadd (%p2739_p5), %s572_s1, 4294967040  ;;  %p3104_p13 = scmp.eq.s32.totalorder %s2567_s0, 0 }
  0xe4   : > { %2406 = dma.done.wait (%p3104_p13), [#allocation7], 32   ;;  %p3105_p0 = pmov %p3104_p13 }
  0xe6   : > { %2408 = vsyncadd (%p3105_p0), [#allocation7], 4294967264  ;;  %p3106_p2 = pmov %p3105_p0 }
  0xe7   : > { %p3107_p8 = pmov %p3105_p0 }
  0xe8   : > { %2410 = dma.done.wait (%p3106_p2), [#allocation10], 8192  }
  0xe9   : > { %2412 = vsyncadd (%p3107_p8), [#allocation10], 4294959104  ;;  %p3108_p10 = pmov %p3105_p0 }
  0xea   : > { %p3109_p11 = pmov %p3105_p0 }
  0xeb   : > { %2414 = dma.done.wait (%p3108_p10), [#allocation13], 16384  }
  0xec   : > { %2416 = vsyncadd (%p3109_p11), [#allocation13], 4294950912  ;;  %v2824_v0 = vld [vmem:[%s575_s21] sm:$0xff]  ;;  %v2827_v1 = vld [vmem:[%s575_s21 + $0x8] sm:$0xff]  ;;  %v2450_v14 = vmov 0.0   ;;  %vm2451_vm0 = vmmov 0   ;;  %v706_v41 = vlaneseq }
  0xed   : > { %655 = vadd.xlane.f32.xlu0 %v2824_v0  ;;  %v1855_v2 = vld [vmem:[%s3051_s4] ss:$0 sm:$0xff]  ;;  %v742_v11 = vld [vmem:[#allocation9] sm:$0xff]  ;;  %1931 = vmatprep.subr.bf16.mxu0 %v2450_v14  ;;  %v744_v15 = vld [vmem:[#allocation9 + $0x10] sm:$0xff]  ;;  %s3110_s28 = sld [smem:[#allocation25_spill]]  ;;  %s3111_s1 = sld [smem:[#allocation26_spill]] }
  0xee   : > { %702 = vst [vmem:[#allocation2] sm:$0xff] %v1855_v2  ;;  %703 = vst [vmem:[#allocation2 + $0x8] sm:$0xff] %v1855_v2  ;;  %v743_v12 = vld [vmem:[#allocation9 + $0x8] sm:$0xff]  ;;  %v745_v16 = vld [vmem:[#allocation9 + $0x18] sm:$0xff]  ;;  %1947 = vmatprep.mubr.msk.bf16.mxu0 %vm2451_vm0, %v2450_v14  ;;  %v2854_v43 = vshrl.u32 %v706_v41, 7  ;;  %s3112_s30 = sld [smem:[#allocation27_spill]] }
  0xef   : > { %v760_v13 = vpack.c.bf16 %v743_v12, %v742_v11  ;;  %v761_v17 = vpack.c.bf16 %v745_v16, %v744_v15  ;;  %v746_v18 = vld [vmem:[#allocation9 + $0x20] sm:$0xff]  ;;  %v747_v19 = vld [vmem:[#allocation9 + $0x28] sm:$0xff]  ;;  %v748_v21 = vld [vmem:[#allocation9 + $0x30] sm:$0xff]  ;;  %s3113_s5 = sld [smem:[#allocation28_spill]]  ;;  %s3114_s7 = sld [smem:[#allocation29_spill]] }
  0xf0   : > { %v762_v20 = vpack.c.bf16 %v747_v19, %v746_v18  ;;  %v749_v22 = vld [vmem:[#allocation9 + $0x38] sm:$0xff]  ;;  %v750_v24 = vld [vmem:[#allocation9 + $0x40] sm:$0xff]  ;;  %v751_v25 = vld [vmem:[#allocation9 + $0x48] sm:$0xff]  ;;  %v2857_v44 = vsub.s32 0, %v2854_v43  ;;  %v2866_v58 = vsub.s32 1, %v2854_v43  ;;  %s3115_s14 = sld [smem:[#allocation30_spill]] }
  0xf1   : > { %657 = vadd.xlane.f32.xlu0 %v2827_v1  ;;  %1932 = vmatpush3.bf16.msra.mxu0 %v760_v13  ;;  %v763_v23 = vpack.c.bf16 %v749_v22, %v748_v21  ;;  %v764_v26 = vpack.c.bf16 %v751_v25, %v750_v24  ;;  %v752_v27 = vld [vmem:[#allocation9 + $0x50] sm:$0xff]  ;;  %v753_v28 = vld [vmem:[#allocation9 + $0x58] sm:$0xff]  ;;  %v754_v30 = vld [vmem:[#allocation9 + $0x60] sm:$0xff]  ;;  %s3116_s2 = sld [smem:[#allocation31_spill]]  ;;  %s1868_s22 = sshll.u32 %s2567_s0, 8 }
  0xf2   : > { %1933 = vmatprep.subr.bf16.mxu0 %v2450_v14  ;;  %v765_v29 = vpack.c.bf16 %v753_v28, %v752_v27  ;;  %v755_v31 = vld [vmem:[#allocation9 + $0x68] sm:$0xff]  ;;  %v756_v33 = vld [vmem:[#allocation9 + $0x70] sm:$0xff]  ;;  %v757_v34 = vld [vmem:[#allocation9 + $0x78] sm:$0xff]  ;;  %s3117_s19 = sld [smem:[#allocation32_spill]]  ;;  %p3118_p12 = scmp.ne.s32.totalorder %s3099_s8, 0 }
  0xf3   : > { %v766_v32 = vpack.c.bf16 %v755_v31, %v754_v30  ;;  %v767_v35 = vpack.c.bf16 %v757_v34, %v756_v33  ;;  %v1853_v46 = vld [vmem:[#allocation6] ss:$0 sm:$0xff]  ;;  %v694_v47 = vld [vmem:[%s3050_s3] sm:$0x7]  ;;  %v1854_v49 = vld [vmem:[#allocation8] ss:$0 sm:$0xff] }
  0xf4   : > { %v709_v50 = vrot.slane %v694_v47, %v2857_v44  ;;  %v721_v63 = vrot.slane %v694_v47, %v2866_v58  ;;  %v1856_v19 = vld [vmem:[%s3053_s6] ss:$0 sm:$0xff]  ;;  %v857_v30 = vld [vmem:[#allocation11] sm:$0xff]  ;;  %v859_v33 = vld [vmem:[#allocation11 + $0x10] sm:$0xff]  ;;  %s2453_s0 = smov [#allocation15]  }
  0xf5   : > { %1934 = vmatpush3.bf16.msra.mxu0 %v761_v17  ;;  %v704_v55 = vld [vmem:[#allocation2 + $0x2] sm:$0xff]  ;;  %v705_v61 = vld [vmem:[#allocation2 + $0xa] sm:$0x3f]  ;;  %s2361_s23 = sshll.u32 %s2453_s0, 4  ;;  %s2362_s23 = int_to_ptr.vmem [resolvable:$false] %s2361_s23 }
  0xf6   : > { %1935 = vmatprep.subr.bf16.mxu0 %v2450_v14  ;;  %v858_v28 = vld [vmem:[#allocation11 + $0x8] sm:$0xff]  ;;  %v868_v41 = vld [vmem:[#allocation11 + $0x58] sm:$0xff] }
  0xf7   : > { %v862_v34 = vld [vmem:[#allocation11 + $0x28] sm:$0xff] }
  0xf9   : > { %1936 = vmatpush3.bf16.msra.mxu0 %v762_v20 }
  0xfa   : > { %1937 = vmatprep.subr.bf16.mxu0 %v2450_v14 }
  0xfd   : > { %1938 = vmatpush3.bf16.msra.mxu0 %v763_v23 }
  0xfe   : > { %1939 = vmatprep.subr.bf16.mxu0 %v2450_v14 }
 0x101   : > { %1940 = vmatpush3.bf16.msra.mxu0 %v764_v26 }
 0x102   : > { %1941 = vmatprep.subr.bf16.mxu0 %v2450_v14 }
 0x105   : > { %1942 = vmatpush3.bf16.msra.mxu0 %v765_v29  ;;  %v861_v29 = vld [vmem:[#allocation11 + $0x20] sm:$0xff] }
 0x106   : > { %1943 = vmatprep.subr.bf16.mxu0 %v2450_v14  ;;  %v908_v31 = vpack.c.bf16 %v861_v29, %v858_v28  ;;  %v890_v29 = vld [vmem:[#allocation11 + $0x108] sm:$0xff] }
 0x108   : > { %947 = vmatprep.subr.bf16.mxu1 %v908_v31  ;;  %v892_v31 = vld [vmem:[#allocation11 + $0x118] sm:$0xff] }
 0x109   : > { %1944 = vmatpush3.bf16.msra.mxu0 %v766_v32  ;;  %v860_v32 = vld [vmem:[#allocation11 + $0x18] sm:$0xff] }
 0x10a   : > { %1945 = vmatprep.subr.bf16.mxu0 %v2450_v14 }
 0x10d   : > { %1946 = vmatpush3.bf16.msra.mxu0 %v767_v35  ;;  %v907_v35 = vpack.c.bf16 %v860_v32, %v857_v30  ;;  %v889_v30 = vld [vmem:[#allocation11 + $0x100] sm:$0xff] }
 0x10e   : > { %1951 = vmatprep.subr.bf16.mxu0 %v2450_v14 }
 0x10f   : > { %948 = vmatpush1.bf16.msra.mxu1 %v907_v35  ;;  %v924_v35 = vpack.c.bf16 %v892_v31, %v889_v30 }
 0x17a   : > { %v656_v3 = vpop.xlane.xlu0 %655 }
 0x17b   : > { %v660_v4 = vmul.f32 0.0078125, %v656_v3 }
 0x17d   : > { %v2834_v5 = vsub.f32 %v2824_v0, %v660_v4 }
 0x17e   : > { %v658_v6 = vpop.xlane.xlu0 %657 }
 0x17f   : > { %v661_v7 = vmul.f32 0.0078125, %v658_v6  ;;  %v664_v8 = vmul.f32 %v2834_v5, %v2834_v5 }
 0x181   : > { %v2839_v9 = vsub.f32 %v2827_v1, %v661_v7  ;;  %666 = vadd.xlane.f32.xlu1 %v664_v8  ;;  %v2870_v8 = vsub.s32 2, %v2854_v43 }
 0x183   : > { %v665_v10 = vmul.f32 %v2839_v9, %v2839_v9 }
 0x185   : > { %668 = vadd.xlane.f32.xlu1 %v665_v10  ;;  %v733_v10 = vrot.slane %v694_v47, %v2870_v8 }
 0x20e   : > { %v667_v36 = vpop.xlane.xlu1 %666 }
 0x20f   : > { %v670_v37 = vmul.f32 0.0078125, %v667_v36  ;;  %v909_v36 = vpack.c.bf16 %v862_v34, %v859_v33  ;;  %v894_v33 = vld [vmem:[#allocation11 + $0x128] sm:$0xff]  ;;  %v897_v34 = vld [vmem:[#allocation11 + $0x140] sm:$0xff] }
 0x211   : > { %v672_v38 = vadd.f32 1e-05, %v670_v37  ;;  %v867_v37 = vld [vmem:[#allocation11 + $0x50] sm:$0xff] }
 0x212   : > { %v669_v39 = vpop.xlane.xlu1 %668 }
 0x213   : > { %2089 = vrsqrt.f32 %v672_v38  ;;  %v671_v40 = vmul.f32 0.0078125, %v669_v39  ;;  %v863_v38 = vld [vmem:[#allocation11 + $0x30] sm:$0xff] }
 0x215   : > { %v673_v42 = vadd.f32 1e-05, %v671_v40  ;;  %v865_v40 = vld [vmem:[#allocation11 + $0x40] sm:$0xff] }
 0x217   : > { %2091 = vrsqrt.f32 %v673_v42 }
 0x21d   : > { %v2090_v45 = vpop.eup %2089 }
 0x21e   : > { %v676_v48 = vmul.f32 %v2090_v45, %v2834_v5  ;;  %v912_v45 = vpack.c.bf16 %v868_v41, %v865_v40  ;;  %v903_v40 = vld [vmem:[#allocation11 + $0x170] sm:$0xff] }
 0x220   : > { %v684_v51 = vmul.f32 %v1853_v46, %v676_v48 }
 0x221   : > { %v2092_v52 = vpop.eup %2091 }
 0x222   : > { %v692_v53 = vadd.f32 %v1854_v49, %v684_v51  ;;  %v677_v54 = vmul.f32 %v2092_v52, %v2839_v9 }
 0x224   : > { %v710_v56 = vmul.f32 %v709_v50, %v692_v53  ;;  %v685_v57 = vmul.f32 %v1853_v46, %v677_v54  ;;  %v722_v3 = vmul.f32 %v721_v63, %v692_v53  ;;  %v734_v12 = vmul.f32 %v733_v10, %v692_v53  ;;  %v870_v54 = vld [vmem:[#allocation11 + $0x68] sm:$0xff] }
 0x226   : > { %v712_v59 = vadd.f32 %v710_v56, %v704_v55  ;;  %v693_v60 = vadd.f32 %v1854_v49, %v685_v57  ;;  %v873_v55 = vld [vmem:[#allocation11 + $0x80] sm:$0xff] }
 0x227   : > { %v914_v56 = vpack.c.bf16 %v873_v55, %v870_v54  ;;  %v869_v57 = vld [vmem:[#allocation11 + $0x60] sm:$0xff] }
 0x228   : > { %714 = vst [vmem:[#allocation2 + $0x2] sm:$0xff] %v712_v59  ;;  %v711_v62 = vmul.f32 %v709_v50, %v693_v60  ;;  %v723_v6 = vmul.f32 %v721_v63, %v693_v60  ;;  %v735_v13 = vmul.f32 %v733_v10, %v693_v60  ;;  %v872_v59 = vld [vmem:[#allocation11 + $0x78] sm:$0xff]  ;;  %v871_v60 = vld [vmem:[#allocation11 + $0x70] sm:$0xff] }
 0x229   : > { %v880_v10 = vld [vmem:[#allocation11 + $0xb8] sm:$0xff] }
 0x22a   : > { %v713_v2 = vadd.f32 %v711_v62, %v705_v61  ;;  %v913_v61 = vpack.c.bf16 %v872_v59, %v869_v57  ;;  %v874_v62 = vld [vmem:[#allocation11 + $0x88] sm:$0xff] }
 0x22b   : > { %v915_v63 = vpack.c.bf16 %v874_v62, %v871_v60  ;;  %v1857_v62 = vld [vmem:[%s3110_s28] ss:$0 sm:$0xff] }
 0x22c   : > { %715 = vst [vmem:[#allocation2 + $0xa] sm:$0x3f] %v713_v2  ;;  %v876_v2 = vld [vmem:[#allocation11 + $0x98] sm:$0xff] }
 0x22f   : > { %v716_v4 = vld [vmem:[#allocation2 + $0x1] sm:$0xff] }
 0x230   : > { %v724_v5 = vadd.f32 %v722_v3, %v716_v4  ;;  %v879_v3 = vld [vmem:[#allocation11 + $0xb0] sm:$0xff] }
 0x231   : > { %v917_v4 = vpack.c.bf16 %v879_v3, %v876_v2 }
 0x232   : > { %726 = vst [vmem:[#allocation2 + $0x1] sm:$0xff] %v724_v5  ;;  %v875_v5 = vld [vmem:[#allocation11 + $0x90] sm:$0xff] }
 0x233   : > { %v717_v7 = vld [vmem:[#allocation2 + $0x9] sm:$0x7f] }
 0x234   : > { %v725_v9 = vadd.f32 %v723_v6, %v717_v7  ;;  %v878_v6 = vld [vmem:[#allocation11 + $0xa8] sm:$0xff]  ;;  %v877_v7 = vld [vmem:[#allocation11 + $0xa0] sm:$0xff] }
 0x236   : > { %727 = vst [vmem:[#allocation2 + $0x9] sm:$0x7f] %v725_v9  ;;  %v916_v9 = vpack.c.bf16 %v878_v6, %v875_v5 }
 0x239   : > { %v728_v11 = vld [vmem:[#allocation2] sm:$0xff] }
 0x23a   : > { %v736_v16 = vadd.f32 %v734_v12, %v728_v11  ;;  %v918_v11 = vpack.c.bf16 %v880_v10, %v877_v7  ;;  %v882_v12 = vld [vmem:[#allocation11 + $0xc8] sm:$0xff] }
 0x23d   : > { %v729_v15 = vld [vmem:[#allocation2 + $0x8] sm:$0xff] }
 0x23e   : > { %v737_v17 = vadd.f32 %v735_v13, %v729_v15  ;;  %v885_v13 = vld [vmem:[#allocation11 + $0xe0] sm:$0xff] }
 0x23f   : > { %v881_v15 = vld [vmem:[#allocation11 + $0xc0] sm:$0xff] }
 0x240   : > { %v759_v18 = vpack.c.bf16 %v737_v17, %v736_v16  ;;  %v920_v16 = vpack.c.bf16 %v885_v13, %v882_v12  ;;  %v884_v17 = vld [vmem:[#allocation11 + $0xd8] sm:$0xff] }
 0x242   : > { %1948 = vmatmul.mubr.bf16.vlgmr.msra.gmra.mrb[0].mxu0 %v759_v18  ;;  %v883_v18 = vld [vmem:[#allocation11 + $0xd0] sm:$0xff] }
 0x243   : > { %1967 = vmatprep.mubr.msk.bf16.mxu0 %vm2451_vm0, %v2450_v14  ;;  %1952 = vmatpush3.bf16.msra.mxu0 %v909_v36  ;;  %v926_v36 = vpack.c.bf16 %v897_v34, %v894_v33 }
 0x244   : > { %1953 = vmatprep.subr.bf16.mxu0 %v2450_v14 }
 0x247   : > { %1954 = vmatpush3.bf16.msra.mxu0 %v912_v45 }
 0x248   : > { %1955 = vmatprep.subr.bf16.mxu0 %v2450_v14 }
 0x24b   : > { %1956 = vmatpush3.bf16.msra.mxu0 %v915_v63 }
 0x24c   : > { %1957 = vmatprep.subr.bf16.mxu0 %v2450_v14 }
 0x24f   : > { %1958 = vmatpush3.bf16.msra.mxu0 %v918_v11 }
 0x250   : > { %1959 = vmatprep.subr.bf16.mxu0 %v2450_v14 }
 0x315   : > { %v808_v20 = vpop.f32.mrb[0].mxu0 }
 0x316   : > { %v809_v21 = vadd.f32 %v1856_v19, %v808_v20  ;;  %v1949_v22 = vpop.f32.mrb[1].mxu0  ;;  %v2452_v20 = vmov 0  }
 0x317   : > { %v811_v23 = vpop.f32.mrb[2].mxu0  ;;  %979 = vmatprep.mubr.bf16.mxu1 %v2452_v20 }
 0x318   : > { %v2879_v24 = vadd.f32 %v809_v21, %v2824_v0  ;;  %v812_v25 = vadd.f32 %v1856_v19, %v811_v23  ;;  %v1950_v26 = vpop.f32.mrb[3].mxu0  ;;  %v864_v0 = vld [vmem:[#allocation11 + $0x38] sm:$0xff]  ;;  %v886_v19 = vld [vmem:[#allocation11 + $0xe8] sm:$0xff]  ;;  %v919_v21 = vpack.c.bf16 %v884_v17, %v881_v15 }
 0x319   : > { %v911_v39 = vpack.c.bf16 %v867_v37, %v864_v0  ;;  %v921_v22 = vpack.c.bf16 %v886_v19, %v883_v18  ;;  %v888_v23 = vld [vmem:[#allocation11 + $0xf8] sm:$0xff]  ;;  %v887_v26 = vld [vmem:[#allocation11 + $0xf0] sm:$0xff]  ;;  %v893_v0 = vld [vmem:[#allocation11 + $0x120] sm:$0xff] }
 0x31a   : > { %v2882_v27 = vadd.f32 %v812_v25, %v2827_v1  ;;  %819 = vadd.xlane.f32.xlu0 %v2879_v24  ;;  %v866_v1 = vld [vmem:[#allocation11 + $0x48] sm:$0xff]  ;;  %v891_v25 = vld [vmem:[#allocation11 + $0x110] sm:$0xff]  ;;  %v922_v32 = vpack.c.bf16 %v890_v29, %v887_v26  ;;  %v896_v37 = vld [vmem:[#allocation11 + $0x138] sm:$0xff] }
 0x31b   : > { %v910_v42 = vpack.c.bf16 %v866_v1, %v863_v38  ;;  %949 = vmatprep.subr.bf16.mxu1 %v911_v39  ;;  %v923_v28 = vpack.c.bf16 %v891_v25, %v888_v23  ;;  %1960 = vmatpush3.bf16.msra.mxu0 %v921_v22  ;;  %v895_v38 = vld [vmem:[#allocation11 + $0x130] sm:$0xff]  ;;  %v898_v39 = vld [vmem:[#allocation11 + $0x148] sm:$0xff]  ;;  %v900_v1 = vld [vmem:[#allocation11 + $0x158] sm:$0xff]  ;;  %v925_v41 = vpack.c.bf16 %v896_v37, %v893_v0 }
 0x31c   : > { %821 = vadd.xlane.f32.xlu1 %v2882_v27  ;;  %1961 = vmatprep.subr.bf16.mxu0 %v2450_v14  ;;  %v929_v45 = vpack.c.bf16 %v903_v40, %v900_v1 }
 0x31d   : > { %950 = vmatpush1.bf16.msra.mxu1 %v910_v42  ;;  %v927_v42 = vpack.c.bf16 %v898_v39, %v895_v38 }
 0x31e   : > { %951 = vmatprep.subr.bf16.mxu1 %v914_v56 }
 0x31f   : > { %1962 = vmatpush3.bf16.msra.mxu0 %v924_v35 }
 0x320   : > { %1963 = vmatprep.subr.bf16.mxu0 %v2450_v14 }
 0x321   : > { %952 = vmatpush1.bf16.msra.mxu1 %v913_v61 }
 0x322   : > { %953 = vmatprep.subr.bf16.mxu1 %v917_v4  ;;  %v1858_v4 = vld [vmem:[%s3111_s1] ss:$0 sm:$0xff] }
 0x323   : > { %1964 = vmatpush3.bf16.msra.mxu0 %v927_v42 }
 0x324   : > { %1965 = vmatprep.subr.bf16.mxu0 %v2450_v14 }
 0x325   : > { %954 = vmatpush1.bf16.msra.mxu1 %v916_v9 }
 0x326   : > { %955 = vmatprep.subr.bf16.mxu1 %v920_v16 }
 0x329   : > { %956 = vmatpush1.bf16.msra.mxu1 %v919_v21 }
 0x32a   : > { %957 = vmatprep.subr.bf16.mxu1 %v923_v28 }
 0x32d   : > { %958 = vmatpush1.bf16.msra.mxu1 %v922_v32 }
 0x32e   : > { %959 = vmatprep.subr.bf16.mxu1 %v926_v36 }
 0x331   : > { %960 = vmatpush1.bf16.msra.mxu1 %v925_v41 }
 0x332   : > { %961 = vmatprep.subr.bf16.mxu1 %v929_v45 }
 0x3a7   : > { %v820_v46 = vpop.xlane.xlu0 %819 }
 0x3a8   : > { %v823_v47 = vmul.f32 0.0078125, %v820_v46  ;;  %v899_v46 = vld [vmem:[#allocation11 + $0x150] sm:$0xff] }
 0x3a9   : > { %v822_v48 = vpop.xlane.xlu1 %821 }
 0x3aa   : > { %v2889_v49 = vsub.f32 %v2879_v24, %v823_v47  ;;  %v824_v50 = vmul.f32 0.0078125, %v822_v48  ;;  %v902_v47 = vld [vmem:[#allocation11 + $0x168] sm:$0xff]  ;;  %v901_v48 = vld [vmem:[#allocation11 + $0x160] sm:$0xff] }
 0x3ac   : > { %v2892_v51 = vsub.f32 %v2882_v27, %v824_v50  ;;  %v827_v52 = vmul.f32 %v2889_v49, %v2889_v49  ;;  %v904_v50 = vld [vmem:[#allocation11 + $0x178] sm:$0xff] }
 0x3ae   : > { %829 = vadd.xlane.f32.xlu0 %v827_v52  ;;  %v828_v53 = vmul.f32 %v2892_v51, %v2892_v51  ;;  %v928_v52 = vpack.c.bf16 %v902_v47, %v899_v46 }
 0x3b0   : > { %831 = vadd.xlane.f32.xlu1 %v828_v53  ;;  %v930_v53 = vpack.c.bf16 %v904_v50, %v901_v48  ;;  %962 = vmatpush1.bf16.msra.mxu1 %v928_v52 }
 0x3b2   : > { %1966 = vmatpush3.bf16.msra.mxu0 %v930_v53 }
 0x43b   : > { %v830_v54 = vpop.xlane.xlu0 %829 }
 0x43c   : > { %v833_v55 = vmul.f32 0.0078125, %v830_v54 }
 0x43d   : > { %v832_v56 = vpop.xlane.xlu1 %831 }
 0x43e   : > { %v835_v57 = vadd.f32 1e-05, %v833_v55  ;;  %v834_v59 = vmul.f32 0.0078125, %v832_v56 }
 0x440   : > { %2093 = vrsqrt.f32 %v835_v57  ;;  %v836_v60 = vadd.f32 1e-05, %v834_v59 }
 0x442   : > { %2095 = vrsqrt.f32 %v836_v60 }
 0x44a   : > { %v2094_v61 = vpop.eup %2093 }
 0x44b   : > { %v839_v63 = vmul.f32 %v2094_v61, %v2889_v49  ;;  %v905_v49 = vld [vmem:[%s3112_s30] sm:$0x7]  ;;  %s649_s30 = scalar_lea.vmem [#allocation15], %s1845_s11  ;;  %s1689_s11 = scalar_lea.sflag [#allocation5], %s2802_s12 }
 0x44c   : > { %v2096_v2 = vpop.eup %2095  ;;  %v943_v10 = vrot.slane %v905_v49, %v2870_v8  ;;  %v939_v11 = vrot.slane %v905_v49, %v2866_v58  ;;  %s1702_s17 = sshll.u32 %s649_s30, 4  ;;  %s2998_s17 = int_to_ptr.vmem [resolvable:$true] %s1702_s17 }
 0x44d   : > { %v840_v14 = vmul.f32 %v2096_v2, %v2892_v51  ;;  %v847_v3 = vmul.f32 %v1857_v62, %v839_v63  ;;  %v935_v51 = vrot.slane %v905_v49, %v2857_v44  ;;  %s2357_s28 = scalar_lea.vmem %s2998_s17, 256  ;;  %p2364_p9 = scmp.lt.s32.totalorder %s2998_s17, %s2362_s23 }
 0x44e   : > { %p2358_p5 = scmp.ne.s32.totalorder %s2998_s17, %s2357_s28 }
 0x44f   : > { %v848_v5 = vmul.f32 %v1857_v62, %v840_v14  ;;  %v855_v6 = vadd.f32 %v1858_v4, %v847_v3 }
 0x450   : > { %p2359_p4 = pnand %p2358_p5, %p3118_p12 }
 0x451   : > { %v856_v7 = vadd.f32 %v1858_v4, %v848_v5 }
 0x452   : > { %p2360_p6 = pneg %p2359_p4 }
 0x453   : > { %v906_v9 = vpack.c.bf16 %v856_v7, %v855_v6 }
 0x455   : > { %980 = vmatmul.mubr.bf16.vlgmr.msra.gmra.mrb[0].mxu1 %v906_v9  ;;  %1968 = vmatmul.mubr.bf16.vlgmr.msra.gmra.mrb[4].mxu0 %v906_v9 }
 0x456   : > { %1401 = vmatprep.mubr.bf16.mxu1 %v2452_v20  ;;  %1444 = vmatprep.mubr.bf16.mxu0 %v2452_v20 }
 0x528   : > { %v981_v12 = vpop.f32.mrb[0].mxu1  ;;  %v1024_v13 = vpop.f32.mrb[4].mxu0 }
 0x529   : > { %v2920_v15 = vadd.f32 %v981_v12, %v935_v51  ;;  %v2922_v16 = vadd.f32 %v1024_v13, %v943_v10  ;;  %v983_v17 = vpop.f32.mrb[1].mxu1  ;;  %v1969_v18 = vpop.f32.mrb[5].mxu0 }
 0x52a   : > { %v2924_v19 = vadd.f32 %v983_v17, %v939_v11  ;;  %v985_v20 = vpop.f32.mrb[2].mxu1  ;;  %v1027_v21 = vpop.f32.mrb[6].mxu0 }
 0x52b   : > { %v1031_v22 = vsub.f32 0.0, %v2920_v15  ;;  %v1085_v23 = vsub.f32 0.0, %v2922_v16  ;;  %v987_v25 = vpop.f32.mrb[3].mxu1  ;;  %v1970_v26 = vpop.f32.mrb[7].mxu0  ;;  %v2929_v29 = vadd.f32 %v985_v20, %v935_v51  ;;  %v2931_v31 = vadd.f32 %v1027_v21, %v943_v10 }
 0x52c   : > { %v1053_v28 = vsub.f32 0.0, %v2924_v19  ;;  %v2933_v32 = vadd.f32 %v987_v25, %v939_v11  ;;  %v1077_v53 = vmax.f32 %v2922_v16, 0.0  ;;  %vm1075_vm1 = vcmp.ge.f32.partialorder %v2922_v16, 0.0 }
 0x52d   : > { %v1035_v30 = vand.u32 2147483647, %v1031_v22  ;;  %v1089_v33 = vand.u32 2147483647, %v1085_v23  ;;  %v1032_v35 = vsub.f32 0.0, %v2929_v29  ;;  %v1086_v1 = vsub.f32 0.0, %v2931_v31 }
 0x52e   : > { %v1057_v34 = vand.u32 2147483647, %v1053_v28  ;;  %v1054_v40 = vsub.f32 0.0, %v2933_v32  ;;  %v1079_v56 = vadd.f32 0.5, %v1077_v53  ;;  %v1078_v14 = vmax.f32 %v2931_v31, 0.0 }
 0x52f   : > { %v1037_v36 = vsub.f32 0.0, %v1035_v30  ;;  %v1091_v0 = vsub.f32 0.0, %v1089_v33  ;;  %v1036_v38 = vand.u32 2147483647, %v1032_v35  ;;  %v1090_v46 = vand.u32 2147483647, %v1086_v1 }
 0x530   : > { %v1059_v37 = vsub.f32 0.0, %v1057_v34  ;;  %v1058_v48 = vand.u32 2147483647, %v1054_v40  ;;  %v1080_v6 = vadd.f32 0.5, %v1078_v14  ;;  %v1033_v11 = vmax.f32 %v1031_v22, 0.0 }
 0x531   : > { %v1039_v39 = vmul.f32 1.442695, %v1037_v36  ;;  %v1093_v41 = vmul.f32 1.442695, %v1091_v0  ;;  %v1038_v45 = vsub.f32 0.0, %v1036_v38  ;;  %v1092_v50 = vsub.f32 0.0, %v1090_v46 }
 0x532   : > { %v1061_v42 = vmul.f32 1.442695, %v1059_v37  ;;  %v1060_v52 = vsub.f32 0.0, %v1058_v48  ;;  %v1087_v15 = vmax.f32 %v1085_v23, 0.0  ;;  %v1055_v21 = vmax.f32 %v1053_v28, 0.0 }
 0x533   : > { %2097 = vpow2.f32 %v1039_v39  ;;  %v1041_v47 = vmul.f32 1.442695, %v1038_v45  ;;  %v1095_v54 = vmul.f32 1.442695, %v1092_v50  ;;  %v1034_v29 = vmax.f32 %v1032_v35, 0.0 }
 0x534   : > { %2099 = vpow2.f32 %v1093_v41  ;;  %v1063_v55 = vmul.f32 1.442695, %v1060_v52  ;;  %v1088_v39 = vmax.f32 %v1086_v1, 0.0  ;;  %v1056_v35 = vmax.f32 %v1054_v40, 0.0 }
 0x535   : > { %2101 = vpow2.f32 %v1061_v42  ;;  %vm1076_vm2 = vcmp.ge.f32.partialorder %v2931_v31, 0.0 }
 0x536   : > { %2103 = vpow2.f32 %v1041_v47 }
 0x537   : > { %2105 = vpow2.f32 %v1095_v54 }
 0x538   : > { %2107 = vpow2.f32 %v1063_v55 }
 0x539   : > { %2109 = vlog2.f32 %v1079_v56 }
 0x53d   : > { %v2098_v57 = vpop.eup %2097 }
 0x53e   : > { %v2100_v59 = vpop.eup %2099  ;;  %v1043_v60 = vadd.f32 1.0, %v2098_v57 }
 0x53f   : > { %v2102_v61 = vpop.eup %2101  ;;  %v1097_v62 = vadd.f32 1.0, %v2100_v59 }
 0x540   : > { %v2104_v63 = vpop.eup %2103  ;;  %2111 = vlog2.f32 %v1043_v60  ;;  %v1065_v2 = vadd.f32 1.0, %v2102_v61 }
 0x541   : > { %2113 = vlog2.f32 %v1097_v62  ;;  %v1044_v3 = vadd.f32 1.0, %v2104_v63  ;;  %v2106_v4 = vpop.eup %2105 }
 0x542   : > { %2115 = vlog2.f32 %v1065_v2  ;;  %v2108_v5 = vpop.eup %2107  ;;  %v1098_v7 = vadd.f32 1.0, %v2106_v4 }
 0x543   : > { %2117 = vlog2.f32 %v1044_v3  ;;  %v1066_v9 = vadd.f32 1.0, %v2108_v5  ;;  %v2110_v49 = vpop.eup %2109 }
 0x544   : > { %2119 = vlog2.f32 %v1098_v7  ;;  %v1082_v0 = vmul.f32 0.6931472, %v2110_v49 }
 0x545   : > { %2121 = vlog2.f32 %v1066_v9 }
 0x546   : > { %2123 = vlog2.f32 %v1080_v6 }
 0x54a   : > { %v2112_v51 = vpop.eup %2111 }
 0x54b   : > { %v2114_v10 = vpop.eup %2113  ;;  %v1046_v12 = vmul.f32 0.6931472, %v2112_v51 }
 0x54c   : > { %v2116_v13 = vpop.eup %2115  ;;  %v1100_v17 = vmul.f32 0.6931472, %v2114_v10 }
 0x54d   : > { %v2118_v18 = vpop.eup %2117  ;;  %v1049_v20 = vadd.f32 %v1046_v12, %v1033_v11  ;;  %v1068_v25 = vmul.f32 0.6931472, %v2116_v13 }
 0x54e   : > { %v1103_v26 = vadd.f32 %v1100_v17, %v1087_v15  ;;  %v1048_v30 = vmul.f32 0.6931472, %v2118_v18  ;;  %v2120_v36 = vpop.eup %2119 }
 0x54f   : > { %v1051_v33 = vsub.f32 0.0, %v1049_v20  ;;  %v1071_v34 = vadd.f32 %v1068_v25, %v1055_v21  ;;  %v2122_v38 = vpop.eup %2121  ;;  %v1102_v19 = vmul.f32 0.6931472, %v2120_v36 }
 0x550   : > { %v1105_v22 = vsub.f32 0.0, %v1103_v26  ;;  %v1050_v37 = vadd.f32 %v1048_v30, %v1034_v29  ;;  %v2124_v28 = vpop.eup %2123  ;;  %v1070_v45 = vmul.f32 0.6931472, %v2122_v38 }
 0x551   : > { %1111 = vst [vmem:[#allocation2] sm:$0xff] %v1051_v33  ;;  %v1073_v23 = vsub.f32 0.0, %v1071_v34  ;;  %v1104_v47 = vadd.f32 %v1102_v19, %v1088_v39  ;;  %v1084_v50 = vmul.f32 0.6931472, %v2124_v28 }
 0x552   : > { %v1107_v41 = vsel %vm1075_vm1, %v1082_v0, %v1105_v22  ;;  %v1052_v42 = vsub.f32 0.0, %v1050_v37  ;;  %v1072_v48 = vadd.f32 %v1070_v45, %v1056_v35 }
 0x553   : > { %v1109_v46 = vadd.f32 %v1107_v41, %v1073_v23  ;;  %v1106_v52 = vsub.f32 0.0, %v1104_v47 }
 0x554   : > { %1112 = vst [vmem:[#allocation2 + $0x8] sm:$0xff] %v1052_v42  ;;  %v1074_v16 = vsub.f32 0.0, %v1072_v48 }
 0x555   : > { %v1108_v53 = vsel %vm1076_vm2, %v1084_v50, %v1106_v52 }
 0x556   : > { %v1110_v54 = vadd.f32 %v1108_v53, %v1074_v16 }
 0x55b   : > { %v1113_v1 = vld [vmem:[#allocation2 + $0x1] sm:$0xff]  ;;  %v1114_v55 = vld [vmem:[#allocation2 + $0x9] sm:$0x7f] }
 0x55c   : > { %v1116_v56 = vld [vmem:[#allocation2 + $0x8] sm:$0x7f]  ;;  %v1117_v57 = vadd.f32 %v1113_v1, %v1051_v33 }
 0x55d   : > { %v1118_v59 = vadd.f32 %v1116_v56, %v1114_v55 }
 0x55e   : > { %1119 = vst [vmem:[#allocation2 + $0x1] sm:$0xff] %v1117_v57 }
 0x55f   : > { %1120 = vst [vmem:[#allocation2 + $0x9] sm:$0x7f] %v1118_v59 }
 0x565   : > { %v1123_v60 = vld [vmem:[#allocation2] sm:$0xff] }
 0x566   : > { %v1121_v32 = vld [vmem:[#allocation2 + $0x2] sm:$0xff]  ;;  %v1122_v40 = vld [vmem:[#allocation2 + $0xa] sm:$0x3f] }
 0x567   : > { %v1124_v61 = vld [vmem:[#allocation2 + $0x8] sm:$0x3f]  ;;  %v1125_v62 = vadd.f32 %v1123_v60, %v1121_v32 }
 0x568   : > { %v1126_v63 = vadd.f32 %v1124_v61, %v1122_v40 }
 0x569   : > { %1127 = vst [vmem:[#allocation2 + $0x2] sm:$0xff] %v1125_v62 }
 0x56a   : > { %1128 = vst [vmem:[#allocation2 + $0xa] sm:$0x3f] %v1126_v63 }
 0x570   : > { %v1131_v2 = vld [vmem:[#allocation2] sm:$0xff] }
 0x571   : > { %v1129_v31 = vld [vmem:[#allocation2 + $0x4] sm:$0xff]  ;;  %v1130_v14 = vld [vmem:[#allocation2 + $0xc] sm:$0xf] }
 0x572   : > { %v1132_v3 = vld [vmem:[#allocation2 + $0x8] sm:$0xf]  ;;  %v1133_v4 = vadd.f32 %v1131_v2, %v1129_v31 }
 0x573   : > { %v1134_v5 = vadd.f32 %v1132_v3, %v1130_v14 }
 0x574   : > { %1135 = vst [vmem:[#allocation2 + $0x4] sm:$0xff] %v1133_v4 }
 0x575   : > { %1136 = vst [vmem:[#allocation2 + $0xc] sm:$0xf] %v1134_v5 }
 0x57b   : > { %v1138_v7 = vld [vmem:[#allocation2] sm:$0xff] }
 0x57c   : > { %v1137_v6 = vld [vmem:[#allocation2 + $0x8] sm:$0xff]  ;;  %v1143_v49 = vsub.f32 %v1109_v46, %v1138_v7 }
 0x57d   : > { %v1139_v9 = vadd.f32 %v1138_v7, %v1137_v6 }
 0x57f   : > { %v1144_v51 = vsub.f32 %v1110_v54, %v1139_v9 }
 0x581   : > { %v1145_v10 = vmax.f32 %v1143_v49, %v1144_v51 }
 0x583   : > { %v1146_v11 = vrot.slane %v1145_v10, 4 }
 0x585   : > { %v1147_v12 = vmax.f32 %v1145_v10, %v1146_v11  ;;  %v1251_v11 = vld [vmem:[#allocation12 + $0x8] sm:$0xff] }
 0x587   : > { %v1148_v13 = vrot.slane %v1147_v12, 2 }
 0x589   : > { %v1149_v15 = vmax.f32 %v1147_v12, %v1148_v13  ;;  %v1255_v12 = vld [vmem:[#allocation12 + $0x28] sm:$0xff]  ;;  %v1253_v13 = vld [vmem:[#allocation12 + $0x18] sm:$0xff] }
 0x58b   : > { %v1150_v17 = vrot.slane %v1149_v15, 1 }
 0x58d   : > { %v1151_v18 = vmax.f32 %v1149_v15, %v1150_v17  ;;  %v1317_v15 = vpack.c.bf16 %v1255_v12, %v1251_v11  ;;  %v1257_v17 = vld [vmem:[#allocation12 + $0x38] sm:$0xff]  ;;  %v1284_v12 = vld [vmem:[#allocation12 + $0x110] sm:$0xff] }
 0x58f   : > { %v1152_v20 = vmax.f32 %v1151_v18, -0.6931472  ;;  %v1250_v18 = vld [vmem:[#allocation12] sm:$0xff]  ;;  %1369 = vmatprep.subr.bf16.mxu1 %v1317_v15 }
 0x591   : > { %v1153_v21 = vsub.f32 %v1143_v49, %v1152_v20  ;;  %v1154_v25 = vsub.f32 %v1144_v51, %v1152_v20  ;;  %v1192_v26 = vadd.f32 %v1152_v20, %v1139_v9  ;;  %v1191_v29 = vadd.f32 %v1152_v20, %v1138_v7 }
 0x592   : > { %v1193_v45 = vsub.f32 -0.6931472, %v1152_v20  ;;  %v1254_v20 = vld [vmem:[#allocation12 + $0x20] sm:$0xff] }
 0x593   : > { %v1155_v30 = vmul.f32 1.442695, %v1153_v21  ;;  %v1157_v33 = vmul.f32 1.442695, %v1154_v25  ;;  %v1319_v21 = vpack.c.bf16 %v1257_v17, %v1253_v13  ;;  %v1316_v25 = vpack.c.bf16 %v1254_v20, %v1250_v18  ;;  %v1288_v13 = vld [vmem:[#allocation12 + $0x130] sm:$0xff]  ;;  %v1291_v17 = vld [vmem:[#allocation12 + $0x148] sm:$0xff] }
 0x594   : > { %v1194_v46 = vmul.f32 1.442695, %v1193_v45  ;;  %v1269_v45 = vld [vmem:[#allocation12 + $0x98] sm:$0xff]  ;;  %v1334_v15 = vpack.c.bf16 %v1288_v13, %v1284_v12  ;;  %v1295_v18 = vld [vmem:[#allocation12 + $0x168] sm:$0xff] }
 0x595   : > { %2125 = vpow2.f32 %v1155_v30  ;;  %1412 = vmatprep.subr.bf16.mxu0 %v1319_v21  ;;  %1370 = vmatpush1.bf16.msra.mxu1 %v1316_v25  ;;  %v1293_v20 = vld [vmem:[#allocation12 + $0x158] sm:$0xff]  ;;  %v1337_v21 = vpack.c.bf16 %v1295_v18, %v1291_v17  ;;  %v1860_v13 = vld [vmem:[%s3114_s7] ss:$0 sm:$0xff]  ;;  %s3003_s7 = scalar_lea.hbm %s3117_s19, %s1868_s22 }
 0x596   : > { %2127 = vpow2.f32 %v1157_v33  ;;  %v1259_v33 = vld [vmem:[#allocation12 + $0x48] sm:$0xff]  ;;  %v1297_v25 = vld [vmem:[#allocation12 + $0x178] sm:$0xff] }
 0x597   : > { %2129 = vpow2.f32 %v1194_v46  ;;  %v1496_v17 = vld [vmem:[#allocation14 + $0x8] sm:$0xff] }
 0x59f   : > { %v2126_v34 = vpop.eup %2125 }
 0x5a0   : > { %v2128_v36 = vpop.eup %2127  ;;  %1159 = vst [vmem:[#allocation2] sm:$0xff] %v2126_v34 }
 0x5a1   : > { %1160 = vst [vmem:[#allocation2 + $0x8] sm:$0xff] %v2128_v36  ;;  %v2130_v54 = vpop.eup %2129  ;;  %v1261_v36 = vld [vmem:[#allocation12 + $0x58] sm:$0xff] }
 0x5a8   : > { %v1161_v0 = vld [vmem:[#allocation2 + $0x1] sm:$0xff]  ;;  %v1162_v22 = vld [vmem:[#allocation2 + $0x9] sm:$0x7f] }
 0x5a9   : > { %v1164_v37 = vld [vmem:[#allocation2 + $0x8] sm:$0x7f]  ;;  %v1165_v38 = vadd.f32 %v2126_v34, %v1161_v0  ;;  %v1263_v34 = vld [vmem:[#allocation12 + $0x68] sm:$0xff] }
 0x5aa   : > { %v1166_v23 = vadd.f32 %v1164_v37, %v1162_v22  ;;  %v1321_v0 = vpack.c.bf16 %v1263_v34, %v1259_v33  ;;  %v1265_v22 = vld [vmem:[#allocation12 + $0x78] sm:$0xff]  ;;  %v1258_v37 = vld [vmem:[#allocation12 + $0x40] sm:$0xff]  ;;  %v1292_v34 = vld [vmem:[#allocation12 + $0x150] sm:$0xff] }
 0x5ab   : > { %1167 = vst [vmem:[#allocation2 + $0x1] sm:$0xff] %v1165_v38  ;;  %v1262_v38 = vld [vmem:[#allocation12 + $0x60] sm:$0xff] }
 0x5ac   : > { %1168 = vst [vmem:[#allocation2 + $0x9] sm:$0x7f] %v1166_v23  ;;  %v1323_v23 = vpack.c.bf16 %v1265_v22, %v1261_v36  ;;  %1371 = vmatprep.subr.bf16.mxu1 %v1321_v0  ;;  %v1296_v36 = vld [vmem:[#allocation12 + $0x170] sm:$0xff]  ;;  %v1299_v22 = vld [vmem:[#allocation12 + $0x188] sm:$0xff] }
 0x5ad   : > { %v1338_v0 = vpack.c.bf16 %v1296_v36, %v1292_v34 }
 0x5b2   : > { %v1171_v28 = vld [vmem:[#allocation2] sm:$0xff] }
 0x5b3   : > { %v1169_v39 = vld [vmem:[#allocation2 + $0x2] sm:$0xff]  ;;  %v1170_v19 = vld [vmem:[#allocation2 + $0xa] sm:$0x3f] }
 0x5b4   : > { %v1172_v41 = vld [vmem:[#allocation2 + $0x8] sm:$0x3f]  ;;  %v1173_v42 = vadd.f32 %v1171_v28, %v1169_v39  ;;  %v1320_v39 = vpack.c.bf16 %v1262_v38, %v1258_v37  ;;  %v1303_v37 = vld [vmem:[#allocation12 + $0x1a8] sm:$0xff] }
 0x5b5   : > { %v1174_v35 = vadd.f32 %v1172_v41, %v1170_v19  ;;  %v1260_v19 = vld [vmem:[#allocation12 + $0x50] sm:$0xff]  ;;  %v1301_v38 = vld [vmem:[#allocation12 + $0x198] sm:$0xff] }
 0x5b6   : > { %1175 = vst [vmem:[#allocation2 + $0x2] sm:$0xff] %v1173_v42  ;;  %v1264_v28 = vld [vmem:[#allocation12 + $0x70] sm:$0xff]  ;;  %1372 = vmatpush1.bf16.msra.mxu1 %v1320_v39  ;;  %v1267_v42 = vld [vmem:[#allocation12 + $0x88] sm:$0xff]  ;;  %v1305_v39 = vld [vmem:[#allocation12 + $0x1b8] sm:$0xff] }
 0x5b7   : > { %1176 = vst [vmem:[#allocation2 + $0xa] sm:$0x3f] %v1174_v35  ;;  %v1322_v41 = vpack.c.bf16 %v1264_v28, %v1260_v19  ;;  %v1271_v35 = vld [vmem:[#allocation12 + $0xa8] sm:$0xff]  ;;  %v1298_v19 = vld [vmem:[#allocation12 + $0x180] sm:$0xff] }
 0x5b8   : > { %v1325_v46 = vpack.c.bf16 %v1271_v35, %v1267_v42  ;;  %v1302_v28 = vld [vmem:[#allocation12 + $0x1a0] sm:$0xff]  ;;  %v1300_v35 = vld [vmem:[#allocation12 + $0x190] sm:$0xff] }
 0x5b9   : > { %v1340_v42 = vpack.c.bf16 %v1302_v28, %v1298_v19 }
 0x5ba   : > { %1373 = vmatprep.subr.bf16.mxu1 %v1325_v46  ;;  %v1307_v46 = vld [vmem:[#allocation12 + $0x1c8] sm:$0xff] }
 0x5bd   : > { %v1179_v47 = vld [vmem:[#allocation2] sm:$0xff] }
 0x5be   : > { %v1177_v48 = vld [vmem:[#allocation2 + $0x4] sm:$0xff]  ;;  %v1178_v50 = vld [vmem:[#allocation2 + $0xc] sm:$0xf] }
 0x5bf   : > { %v1180_v52 = vld [vmem:[#allocation2 + $0x8] sm:$0xf]  ;;  %v1181_v16 = vadd.f32 %v1179_v47, %v1177_v48  ;;  %v1273_v47 = vld [vmem:[#allocation12 + $0xb8] sm:$0xff]  ;;  %v1266_v48 = vld [vmem:[#allocation12 + $0x80] sm:$0xff] }
 0x5c0   : > { %v1182_v53 = vadd.f32 %v1180_v52, %v1178_v50  ;;  %v1270_v50 = vld [vmem:[#allocation12 + $0xa0] sm:$0xff]  ;;  %v1327_v52 = vpack.c.bf16 %v1273_v47, %v1269_v45  ;;  %v1304_v45 = vld [vmem:[#allocation12 + $0x1b0] sm:$0xff] }
 0x5c1   : > { %1183 = vst [vmem:[#allocation2 + $0x4] sm:$0xff] %v1181_v16  ;;  %v1324_v16 = vpack.c.bf16 %v1270_v50, %v1266_v48  ;;  %v1342_v47 = vpack.c.bf16 %v1304_v45, %v1300_v35  ;;  %v1311_v48 = vld [vmem:[#allocation12 + $0x1e8] sm:$0xff]  ;;  %v1309_v50 = vld [vmem:[#allocation12 + $0x1d8] sm:$0xff]  ;;  %v1547_v35 = vld [vmem:[#allocation14 + $0x1a0] sm:$0xff] }
 0x5c2   : > { %1184 = vst [vmem:[#allocation2 + $0xc] sm:$0xf] %v1182_v53  ;;  %v1268_v53 = vld [vmem:[#allocation12 + $0x90] sm:$0xff] }
 0x5c3   : > { %1374 = vmatpush1.bf16.msra.mxu1 %v1324_v16  ;;  %v1345_v16 = vpack.c.bf16 %v1311_v48, %v1307_v46  ;;  %v1548_v46 = vld [vmem:[#allocation14 + $0x1a8] sm:$0xff]  ;;  %v1499_v48 = vld [vmem:[#allocation14 + $0x20] sm:$0xff] }
 0x5c8   : > { %v1189_v1 = vld [vmem:[#allocation2] sm:$0xff] }
 0x5c9   : > { %v1185_v55 = vld [vmem:[#allocation2 + $0x8] sm:$0xff]  ;;  %v1196_v56 = vadd.f32 %v2130_v54, %v1189_v1 }
 0x5ca   : > { %v1187_v57 = vadd.f32 %v1189_v1, %v1185_v55  ;;  %v1275_v55 = vld [vmem:[#allocation12 + $0xc8] sm:$0xff] }
 0x5cb   : > { %2131 = vlog2.f32 %v1196_v56  ;;  %v1279_v56 = vld [vmem:[#allocation12 + $0xe8] sm:$0xff] }
 0x5cc   : > { %1188 = vst [vmem:[#allocation2 + $0x8] sm:$0xff] %v1187_v57  ;;  %v1197_v59 = vadd.f32 %v2130_v54, %v1187_v57  ;;  %v1272_v54 = vld [vmem:[#allocation12 + $0xb0] sm:$0xff]  ;;  %v1277_v57 = vld [vmem:[#allocation12 + $0xd8] sm:$0xff] }
 0x5cd   : > { %v1326_v1 = vpack.c.bf16 %v1272_v54, %v1268_v53  ;;  %v1306_v54 = vld [vmem:[#allocation12 + $0x1c0] sm:$0xff] }
 0x5ce   : > { %2133 = vlog2.f32 %v1197_v59  ;;  %v1329_v59 = vpack.c.bf16 %v1279_v56, %v1275_v55  ;;  %v1308_v55 = vld [vmem:[#allocation12 + $0x1d0] sm:$0xff] }
 0x5d0   : > { %1375 = vmatprep.subr.bf16.mxu1 %v1329_v59 }
 0x5d5   : > { %v2132_v32 = vpop.eup %2131 }
 0x5d6   : > { %v1199_v40 = vmul.f32 0.6931472, %v2132_v32  ;;  %v1281_v32 = vld [vmem:[#allocation12 + $0xf8] sm:$0xff] }
 0x5d8   : > { %v2134_v60 = vpop.eup %2133  ;;  %v1202_v61 = vadd.f32 %v1199_v40, %v1191_v29  ;;  %v1256_v29 = vld [vmem:[#allocation12 + $0x30] sm:$0xff]  ;;  %v1274_v40 = vld [vmem:[#allocation12 + $0xc0] sm:$0xff] }
 0x5d9   : > { %v1201_v62 = vmul.f32 0.6931472, %v2134_v60  ;;  %v1278_v60 = vld [vmem:[#allocation12 + $0xe0] sm:$0xff] }
 0x5da   : > { %v1204_v63 = vmul.f32 1.442695, %v1202_v61  ;;  %v1331_v61 = vpack.c.bf16 %v1281_v32, %v1277_v57  ;;  %v1312_v57 = vld [vmem:[#allocation12 + $0x1f0] sm:$0xff]  ;;  %v1511_v32 = vld [vmem:[#allocation14 + $0x80] sm:$0xff] }
 0x5db   : > { %v1203_v2 = vadd.f32 %v1201_v62, %v1192_v26  ;;  %v1252_v26 = vld [vmem:[#allocation12 + $0x10] sm:$0xff]  ;;  %v1328_v62 = vpack.c.bf16 %v1278_v60, %v1274_v40  ;;  %v1346_v59 = vpack.c.bf16 %v1312_v57, %v1308_v55  ;;  %v1512_v40 = vld [vmem:[#allocation14 + $0x88] sm:$0xff]  ;;  %v1543_v60 = vld [vmem:[#allocation14 + $0x180] sm:$0xff] }
 0x5dc   : > { %2135 = vpow2.f32 %v1204_v63  ;;  %v1318_v30 = vpack.c.bf16 %v1256_v29, %v1252_v26  ;;  %v1276_v63 = vld [vmem:[#allocation12 + $0xd0] sm:$0xff]  ;;  %v1290_v26 = vld [vmem:[#allocation12 + $0x140] sm:$0xff]  ;;  %v1518_v55 = vld [vmem:[#allocation14 + $0xb8] sm:$0xff] }
 0x5dd   : > { %v1206_v31 = vmul.f32 1.442695, %v1203_v2  ;;  %v1280_v2 = vld [vmem:[#allocation12 + $0xf0] sm:$0xff]  ;;  %1376 = vmatpush1.bf16.msra.mxu1 %v1328_v62  ;;  %v1294_v29 = vld [vmem:[#allocation12 + $0x160] sm:$0xff]  ;;  %v1544_v62 = vld [vmem:[#allocation14 + $0x188] sm:$0xff] }
 0x5de   : > { %1413 = vmatpush1.bf16.msra.mxu0 %v1318_v30  ;;  %v1339_v30 = vpack.c.bf16 %v1297_v25, %v1293_v20  ;;  %v1336_v33 = vpack.c.bf16 %v1294_v29, %v1290_v26  ;;  %v1527_v20 = vld [vmem:[#allocation14 + $0x100] sm:$0xff]  ;;  %v1513_v25 = vld [vmem:[#allocation14 + $0x90] sm:$0xff]  ;;  %v1514_v26 = vld [vmem:[#allocation14 + $0x98] sm:$0xff] }
 0x5df   : > { %2137 = vpow2.f32 %v1206_v31  ;;  %1414 = vmatprep.subr.bf16.mxu0 %v1323_v23  ;;  %v1330_v31 = vpack.c.bf16 %v1280_v2, %v1276_v63  ;;  %v1341_v23 = vpack.c.bf16 %v1303_v37, %v1299_v22  ;;  %v1588_v63 = vpack.c.bf16 %v1544_v62, %v1543_v60  ;;  %v1545_v29 = vld [vmem:[#allocation14 + $0x190] sm:$0xff] }
 0x5e0   : > { %v1573_v22 = vpack.c.bf16 %v1514_v26, %v1513_v25  ;;  %v1533_v62 = vld [vmem:[#allocation14 + $0x130] sm:$0xff]  ;;  %v1506_v26 = vld [vmem:[#allocation14 + $0x58] sm:$0xff] }
 0x5e1   : > { %v1505_v25 = vld [vmem:[#allocation14 + $0x50] sm:$0xff] }
 0x5e2   : > { %1415 = vmatpush1.bf16.msra.mxu0 %v1322_v41  ;;  %v1343_v41 = vpack.c.bf16 %v1305_v39, %v1301_v38  ;;  %v1498_v38 = vld [vmem:[#allocation14 + $0x18] sm:$0xff] }
 0x5e3   : > { %1416 = vmatprep.subr.bf16.mxu0 %v1327_v52  ;;  %v1313_v52 = vld [vmem:[#allocation12 + $0x1f8] sm:$0xff] }
 0x5e4   : > { %v1347_v53 = vpack.c.bf16 %v1313_v52, %v1309_v50  ;;  %v1530_v39 = vld [vmem:[#allocation14 + $0x118] sm:$0xff]  ;;  %v1500_v50 = vld [vmem:[#allocation14 + $0x28] sm:$0xff]  ;;  %v1531_v52 = vld [vmem:[#allocation14 + $0x120] sm:$0xff] }
 0x5e6   : > { %v2136_v14 = vpop.eup %2135  ;;  %1417 = vmatpush1.bf16.msra.mxu0 %v1326_v1  ;;  %v1310_v1 = vld [vmem:[#allocation12 + $0x1e0] sm:$0xff] }
 0x5e7   : > { %v2959_v3 = vadd.f32 %v2136_v14, %v2879_v24  ;;  %1418 = vmatprep.subr.bf16.mxu0 %v1331_v61  ;;  %v1283_v14 = vld [vmem:[#allocation12 + $0x108] sm:$0xff]  ;;  %v1344_v56 = vpack.c.bf16 %v1310_v1, %v1306_v54  ;;  %v1572_v61 = vpack.c.bf16 %v1512_v40, %v1511_v32  ;;  %v1517_v1 = vld [vmem:[#allocation14 + $0xb0] sm:$0xff]  ;;  %v1502_v40 = vld [vmem:[#allocation14 + $0x38] sm:$0xff] }
 0x5e8   : > { %v1575_v57 = vpack.c.bf16 %v1518_v55, %v1517_v1  ;;  %v1501_v32 = vld [vmem:[#allocation14 + $0x30] sm:$0xff]  ;;  %v1542_v1 = vld [vmem:[#allocation14 + $0x178] sm:$0xff] }
 0x5e9   : > { %v2138_v4 = vpop.eup %2137  ;;  %1212 = vadd.xlane.f32.xlu0 %v2959_v3 }
 0x5ea   : > { %v2963_v5 = vadd.f32 %v2138_v4, %v2882_v27  ;;  %v1287_v4 = vld [vmem:[#allocation12 + $0x128] sm:$0xff]  ;;  %1419 = vmatpush1.bf16.msra.mxu0 %v1330_v31 }
 0x5ec   : > { %1214 = vadd.xlane.f32.xlu1 %v2963_v5 }
 0x676   : > { %v1213_v6 = vpop.xlane.xlu0 %1212 }
 0x677   : > { %v1216_v7 = vmul.f32 0.0078125, %v1213_v6  ;;  %v1285_v6 = vld [vmem:[#allocation12 + $0x118] sm:$0xff] }
 0x679   : > { %v1215_v9 = vpop.xlane.xlu1 %1214  ;;  %v2967_v49 = vsub.f32 %v2959_v3, %v1216_v7  ;;  %v1333_v7 = vpack.c.bf16 %v1287_v4, %v1283_v14 }
 0x67a   : > { %v1217_v51 = vmul.f32 0.0078125, %v1215_v9  ;;  %v1289_v9 = vld [vmem:[#allocation12 + $0x138] sm:$0xff] }
 0x67b   : > { %v1220_v10 = vmul.f32 %v2967_v49, %v2967_v49  ;;  %1377 = vmatprep.subr.bf16.mxu1 %v1333_v7 }
 0x67c   : > { %v2972_v24 = vsub.f32 %v2963_v5, %v1217_v51  ;;  %v1282_v51 = vld [vmem:[#allocation12 + $0x100] sm:$0xff] }
 0x67d   : > { %1222 = vadd.xlane.f32.xlu0 %v1220_v10  ;;  %v1286_v10 = vld [vmem:[#allocation12 + $0x120] sm:$0xff] }
 0x67e   : > { %v1221_v27 = vmul.f32 %v2972_v24, %v2972_v24  ;;  %v1332_v11 = vpack.c.bf16 %v1286_v10, %v1282_v51  ;;  %v1859_v51 = vld [vmem:[%s3113_s5] ss:$0 sm:$0xff] }
 0x680   : > { %1224 = vadd.xlane.f32.xlu1 %v1221_v27  ;;  %v1335_v27 = vpack.c.bf16 %v1289_v9, %v1285_v6  ;;  %1378 = vmatpush1.bf16.msra.mxu1 %v1332_v11 }
 0x681   : > { %1379 = vmatprep.subr.bf16.mxu1 %v1337_v21  ;;  %v1528_v21 = vld [vmem:[#allocation14 + $0x108] sm:$0xff] }
 0x682   : > { %1420 = vmatprep.subr.bf16.mxu0 %v1335_v27  ;;  %v1580_v36 = vpack.c.bf16 %v1528_v21, %v1527_v20  ;;  %v1554_v21 = vld [vmem:[#allocation14 + $0x1d8] sm:$0xff] }
 0x683   : > { %1421 = vmatpush1.bf16.msra.mxu0 %v1334_v15  ;;  %v1495_v15 = vld [vmem:[#allocation14] sm:$0xff] }
 0x684   : > { %1422 = vmatprep.subr.bf16.mxu0 %v1339_v30  ;;  %1380 = vmatpush1.bf16.msra.mxu1 %v1336_v33  ;;  %v1546_v30 = vld [vmem:[#allocation14 + $0x198] sm:$0xff] }
 0x685   : > { %1381 = vmatprep.subr.bf16.mxu1 %v1341_v23  ;;  %v1589_v37 = vpack.c.bf16 %v1546_v30, %v1545_v29  ;;  %v1529_v23 = vld [vmem:[#allocation14 + $0x110] sm:$0xff]  ;;  %v1569_v30 = vpack.c.bf16 %v1506_v26, %v1505_v25 }
 0x686   : > { %v1581_v28 = vpack.c.bf16 %v1530_v39, %v1529_v23  ;;  %v1508_v23 = vld [vmem:[#allocation14 + $0x68] sm:$0xff] }
 0x687   : > { %1423 = vmatpush1.bf16.msra.mxu0 %v1338_v0  ;;  %v1497_v0 = vld [vmem:[#allocation14 + $0x10] sm:$0xff] }
 0x688   : > { %1424 = vmatprep.subr.bf16.mxu0 %v1343_v41  ;;  %1382 = vmatpush1.bf16.msra.mxu1 %v1340_v42  ;;  %v1565_v19 = vpack.c.bf16 %v1498_v38, %v1497_v0  ;;  %v1515_v41 = vld [vmem:[#allocation14 + $0xa0] sm:$0xff]  ;;  %v1516_v42 = vld [vmem:[#allocation14 + $0xa8] sm:$0xff] }
 0x689   : > { %1383 = vmatprep.subr.bf16.mxu1 %v1345_v16  ;;  %v1574_v45 = vpack.c.bf16 %v1516_v42, %v1515_v41  ;;  %v1566_v16 = vpack.c.bf16 %v1500_v50, %v1499_v48  ;;  %v1524_v0 = vld [vmem:[#allocation14 + $0xe8] sm:$0xff]  ;;  %v1507_v38 = vld [vmem:[#allocation14 + $0x60] sm:$0xff]  ;;  %v1558_v48 = vld [vmem:[#allocation14 + $0x1f8] sm:$0xff] }
 0x68a   : > { %v1540_v41 = vld [vmem:[#allocation14 + $0x168] sm:$0xff]  ;;  %v1509_v50 = vld [vmem:[#allocation14 + $0x70] sm:$0xff] }
 0x68b   : > { %1425 = vmatpush1.bf16.msra.mxu0 %v1342_v47  ;;  %v1590_v47 = vpack.c.bf16 %v1548_v46, %v1547_v35  ;;  %v1525_v35 = vld [vmem:[#allocation14 + $0xf0] sm:$0xff] }
 0x68c   : > { %1426 = vmatprep.subr.bf16.mxu0 %v1347_v53  ;;  %1384 = vmatpush1.bf16.msra.mxu1 %v1344_v56  ;;  %v1532_v53 = vld [vmem:[#allocation14 + $0x128] sm:$0xff]  ;;  %v1549_v56 = vld [vmem:[#allocation14 + $0x1b0] sm:$0xff] }
 0x68d   : > { %1887 = vmatprep.subr.bf16.mxu1 %v1572_v61  ;;  %v1582_v54 = vpack.c.bf16 %v1532_v53, %v1531_v52  ;;  %v1567_v61 = vpack.c.bf16 %v1502_v40, %v1501_v32  ;;  %v1557_v46 = vld [vmem:[#allocation14 + $0x1f0] sm:$0xff]  ;;  %v1510_v52 = vld [vmem:[#allocation14 + $0x78] sm:$0xff] }
 0x68e   : > { %v1571_v53 = vpack.c.bf16 %v1510_v52, %v1509_v50 }
 0x68f   : > { %1427 = vmatpush1.bf16.msra.mxu0 %v1346_v59  ;;  %v1550_v59 = vld [vmem:[#allocation14 + $0x1b8] sm:$0xff] }
 0x690   : > { %1909 = vmatprep.subr.bf16.mxu0 %v1588_v63  ;;  %v1591_v60 = vpack.c.bf16 %v1550_v59, %v1549_v56  ;;  %v1534_v63 = vld [vmem:[#allocation14 + $0x138] sm:$0xff]  ;;  %v1314_v56 = vld [vmem:[%s3115_s14] sm:$0xf]  ;;  %s2363_s14 = scalar_lea.vmem %s2362_s23, 512 }
 0x691   : > { %v1352_v59 = vrot.slane %v1314_v56, %v2857_v44  ;;  %v1360_v32 = vrot.slane %v1314_v56, %v2870_v8  ;;  %v1356_v40 = vrot.slane %v1314_v56, %v2866_v58  ;;  %p2365_p1 = scmp.lt.s32.totalorder %s2363_s14, %s2357_s28 }
 0x693   : > { %p2366_p3 = por %p2365_p1, %p2364_p9 }
 0x695   : > { %p2367_p7 = pnand %p2366_p3, %p2360_p6 }
 0x70a   : > { %v1223_v2 = vpop.xlane.xlu0 %1222 }
 0x70b   : > { %v1226_v31 = vmul.f32 0.0078125, %v1223_v2  ;;  %v1583_v2 = vpack.c.bf16 %v1534_v63, %v1533_v62 }
 0x70d   : > { %v1225_v14 = vpop.xlane.xlu1 %1224  ;;  %v1228_v4 = vadd.f32 1e-05, %v1226_v31  ;;  %v1519_v31 = vld [vmem:[#allocation14 + $0xc0] sm:$0xff] }
 0x70e   : > { %v1227_v6 = vmul.f32 0.0078125, %v1225_v14  ;;  %v1520_v14 = vld [vmem:[#allocation14 + $0xc8] sm:$0xff] }
 0x70f   : > { %2139 = vrsqrt.f32 %v1228_v4  ;;  %v1551_v4 = vld [vmem:[#allocation14 + $0x1c0] sm:$0xff] }
 0x710   : > { %v1229_v7 = vadd.f32 1e-05, %v1227_v6  ;;  %v1576_v6 = vpack.c.bf16 %v1520_v14, %v1519_v31 }
 0x712   : > { %2141 = vrsqrt.f32 %v1229_v7  ;;  %v1552_v7 = vld [vmem:[#allocation14 + $0x1c8] sm:$0xff] }
 0x719   : > { %v2140_v9 = vpop.eup %2139 }
 0x71a   : > { %v1232_v10 = vmul.f32 %v2140_v9, %v2967_v49  ;;  %v1564_v49 = vpack.c.bf16 %v1496_v17, %v1495_v15  ;;  %v1503_v9 = vld [vmem:[#allocation14 + $0x40] sm:$0xff]  ;;  %v1521_v15 = vld [vmem:[#allocation14 + $0xd0] sm:$0xff]  ;;  %v1522_v17 = vld [vmem:[#allocation14 + $0xd8] sm:$0xff] }
 0x71b   : > { %v1577_v20 = vpack.c.bf16 %v1522_v17, %v1521_v15 }
 0x71c   : > { %v2142_v27 = vpop.eup %2141  ;;  %v1240_v12 = vmul.f32 %v1859_v51, %v1232_v10  ;;  %v1592_v10 = vpack.c.bf16 %v1552_v7, %v1551_v4 }
 0x71d   : > { %v1233_v11 = vmul.f32 %v2142_v27, %v2972_v24 }
 0x71e   : > { %v1248_v33 = vadd.f32 %v1860_v13, %v1240_v12  ;;  %v1536_v12 = vld [vmem:[#allocation14 + $0x148] sm:$0xff] }
 0x71f   : > { %v1241_v18 = vmul.f32 %v1859_v51, %v1233_v11  ;;  %v1504_v51 = vld [vmem:[#allocation14 + $0x48] sm:$0xff]  ;;  %v1535_v11 = vld [vmem:[#allocation14 + $0x140] sm:$0xff] }
 0x720   : > { %v1568_v27 = vpack.c.bf16 %v1504_v51, %v1503_v9 }
 0x721   : > { %v1249_v34 = vadd.f32 %v1860_v13, %v1241_v18  ;;  %v1584_v13 = vpack.c.bf16 %v1536_v12, %v1535_v11  ;;  %v1553_v18 = vld [vmem:[#allocation14 + $0x1d0] sm:$0xff] }
 0x722   : > { %v1593_v29 = vpack.c.bf16 %v1554_v21, %v1553_v18 }
 0x723   : > { %v1315_v24 = vpack.c.bf16 %v1249_v34, %v1248_v33  ;;  %v1537_v33 = vld [vmem:[#allocation14 + $0x150] sm:$0xff]  ;;  %v1538_v34 = vld [vmem:[#allocation14 + $0x158] sm:$0xff] }
 0x725   : > { %1402 = vmatmul.mubr.bf16.vlgmr.msra.gmra.mrb[4].mxu1 %v1315_v24  ;;  %1445 = vmatmul.mubr.bf16.vlgmr.msra.gmra.mrb[8].mxu0 %v1315_v24  ;;  %v1555_v24 = vld [vmem:[#allocation14 + $0x1e0] sm:$0xff] }
 0x726   : > { %1888 = vmatpush3.bf16.msra.mxu1 %v1564_v49  ;;  %1910 = vmatpush3.bf16.msra.mxu0 %v1580_v36  ;;  %v1585_v49 = vpack.c.bf16 %v1538_v34, %v1537_v33  ;;  %v1523_v36 = vld [vmem:[#allocation14 + $0xe0] sm:$0xff] }
 0x727   : > { %1889 = vmatprep.subr.bf16.mxu1 %v1573_v22  ;;  %1911 = vmatprep.subr.bf16.mxu0 %v1589_v37  ;;  %v1578_v22 = vpack.c.bf16 %v1524_v0, %v1523_v36  ;;  %v1556_v37 = vld [vmem:[#allocation14 + $0x1e8] sm:$0xff] }
 0x728   : > { %v1594_v39 = vpack.c.bf16 %v1556_v37, %v1555_v24 }
 0x72a   : > { %1890 = vmatpush3.bf16.msra.mxu1 %v1565_v19  ;;  %1912 = vmatpush3.bf16.msra.mxu0 %v1581_v28  ;;  %v1570_v19 = vpack.c.bf16 %v1508_v23, %v1507_v38  ;;  %v1539_v28 = vld [vmem:[#allocation14 + $0x160] sm:$0xff] }
 0x72b   : > { %1891 = vmatprep.subr.bf16.mxu1 %v1574_v45  ;;  %1913 = vmatprep.subr.bf16.mxu0 %v1590_v47  ;;  %v1586_v42 = vpack.c.bf16 %v1540_v41, %v1539_v28  ;;  %v1526_v45 = vld [vmem:[#allocation14 + $0xf8] sm:$0xff] }
 0x72c   : > { %v1579_v47 = vpack.c.bf16 %v1526_v45, %v1525_v35 }
 0x72e   : > { %1892 = vmatpush3.bf16.msra.mxu1 %v1566_v16  ;;  %1914 = vmatpush3.bf16.msra.mxu0 %v1582_v54  ;;  %v1595_v16 = vpack.c.bf16 %v1558_v48, %v1557_v46  ;;  %v1541_v54 = vld [vmem:[#allocation14 + $0x170] sm:$0xff] }
 0x72f   : > { %1893 = vmatprep.subr.bf16.mxu1 %v1575_v57  ;;  %1915 = vmatprep.subr.bf16.mxu0 %v1591_v60  ;;  %v1587_v55 = vpack.c.bf16 %v1542_v1, %v1541_v54  ;;  %v1363_v57 = vsub.s32 3, %v2854_v43 }
 0x731   : > { %v1364_v60 = vrot.slane %v1314_v56, %v1363_v57 }
 0x732   : > { %1894 = vmatpush3.bf16.msra.mxu1 %v1567_v61  ;;  %1916 = vmatpush3.bf16.msra.mxu0 %v1583_v2 }
 0x733   : > { %1895 = vmatprep.subr.bf16.mxu1 %v1576_v6  ;;  %1917 = vmatprep.subr.bf16.mxu0 %v1592_v10 }
 0x736   : > { %1896 = vmatpush3.bf16.msra.mxu1 %v1568_v27  ;;  %1918 = vmatpush3.bf16.msra.mxu0 %v1584_v13 }
 0x737   : > { %1897 = vmatprep.subr.bf16.mxu1 %v1577_v20  ;;  %1919 = vmatprep.subr.bf16.mxu0 %v1593_v29 }
 0x73a   : > { %1898 = vmatpush3.bf16.msra.mxu1 %v1569_v30  ;;  %1920 = vmatpush3.bf16.msra.mxu0 %v1585_v49 }
 0x73b   : > { %1899 = vmatprep.subr.bf16.mxu1 %v1578_v22  ;;  %1921 = vmatprep.subr.bf16.mxu0 %v1594_v39 }
 0x73e   : > { %1900 = vmatpush3.bf16.msra.mxu1 %v1570_v19  ;;  %1922 = vmatpush3.bf16.msra.mxu0 %v1586_v42 }
 0x73f   : > { %1901 = vmatprep.subr.bf16.mxu1 %v1579_v47  ;;  %1923 = vmatprep.subr.bf16.mxu0 %v1595_v16 }
 0x742   : > { %1902 = vmatpush3.bf16.msra.mxu1 %v1571_v53  ;;  %1924 = vmatpush3.bf16.msra.mxu0 %v1587_v55 }
 0x7f8   : > { %v1403_v61 = vpop.f32.mrb[4].mxu1  ;;  %v1446_v62 = vpop.f32.mrb[8].mxu0 }
 0x7f9   : > { %v1404_v63 = vadd.f32 %v1403_v61, %v1352_v59  ;;  %v1447_v2 = vadd.f32 %v1446_v62, %v1360_v32  ;;  %v1405_v31 = vpop.f32.mrb[5].mxu1  ;;  %v1448_v14 = vpop.f32.mrb[9].mxu0  ;;  %v1861_v61 = vld [vmem:[%s3116_s2] ss:$0 sm:$0xff] }
 0x7fa   : > { %v1406_v4 = vadd.f32 %v1405_v31, %v1356_v40  ;;  %v1449_v6 = vadd.f32 %v1448_v14, %v1364_v60  ;;  %v1407_v7 = vpop.f32.mrb[6].mxu1  ;;  %v1450_v9 = vpop.f32.mrb[10].mxu0 }
 0x7fb   : > { %v1463_v51 = vmul.f32 0.70710677, %v1404_v63  ;;  %v1465_v10 = vmul.f32 0.70710677, %v1447_v2  ;;  %v1408_v44 = vadd.f32 %v1407_v7, %v1352_v59  ;;  %v1451_v8 = vadd.f32 %v1450_v9, %v1360_v32  ;;  %v1409_v11 = vpop.f32.mrb[7].mxu1  ;;  %v1452_v58 = vpop.f32.mrb[11].mxu0 }
 0x7fc   : > { %v1464_v43 = vmul.f32 0.70710677, %v1406_v4  ;;  %v1466_v27 = vmul.f32 0.70710677, %v1449_v6  ;;  %v1410_v12 = vadd.f32 %v1409_v11, %v1356_v40  ;;  %v1453_v13 = vadd.f32 %v1452_v58, %v1364_v60 }
 0x7fd   : > { %2143 = verf.f32 %v1463_v51  ;;  %v1467_v15 = vmul.f32 0.70710677, %v1408_v44  ;;  %v1469_v17 = vmul.f32 0.70710677, %v1451_v8  ;;  %v1455_v34 = vmul.f32 0.5, %v1404_v63 }
 0x7fe   : > { %2145 = verf.f32 %v1465_v10  ;;  %v1468_v18 = vmul.f32 0.70710677, %v1410_v12  ;;  %v1470_v20 = vmul.f32 0.70710677, %v1453_v13  ;;  %v1457_v49 = vmul.f32 0.5, %v1447_v2 }
 0x7ff   : > { %2147 = verf.f32 %v1464_v43  ;;  %v1456_v24 = vmul.f32 0.5, %v1406_v4  ;;  %v1459_v37 = vmul.f32 0.5, %v1408_v44  ;;  %v1458_v39 = vmul.f32 0.5, %v1449_v6 }
 0x800   : > { %2149 = verf.f32 %v1466_v27  ;;  %v1461_v28 = vmul.f32 0.5, %v1451_v8  ;;  %v1460_v46 = vmul.f32 0.5, %v1410_v12  ;;  %v1462_v52 = vmul.f32 0.5, %v1453_v13 }
 0x801   : > { %2151 = verf.f32 %v1467_v15 }
 0x802   : > { %2153 = verf.f32 %v1469_v17 }
 0x803   : > { %2155 = verf.f32 %v1468_v18 }
 0x804   : > { %2157 = verf.f32 %v1470_v20 }
 0x807   : > { %v2144_v21 = vpop.eup %2143 }
 0x808   : > { %v2146_v25 = vpop.eup %2145  ;;  %v1479_v30 = vadd.f32 1.0, %v2144_v21 }
 0x809   : > { %v2148_v26 = vpop.eup %2147  ;;  %v1481_v36 = vadd.f32 1.0, %v2146_v25 }
 0x80a   : > { %v2150_v29 = vpop.eup %2149  ;;  %v1480_v22 = vadd.f32 1.0, %v2148_v26  ;;  %v1487_v35 = vmul.f32 %v1479_v30, %v1455_v34 }
 0x80b   : > { %v2152_v33 = vpop.eup %2151  ;;  %v1482_v19 = vadd.f32 1.0, %v2150_v29  ;;  %v1489_v48 = vmul.f32 %v1481_v36, %v1457_v49 }
 0x80c   : > { %v2154_v0 = vpop.eup %2153  ;;  %v1483_v38 = vadd.f32 1.0, %v2152_v33  ;;  %v1488_v53 = vmul.f32 %v1480_v22, %v1456_v24 }
 0x80d   : > { %v2156_v23 = vpop.eup %2155  ;;  %v1485_v41 = vadd.f32 1.0, %v2154_v0  ;;  %v1490_v55 = vmul.f32 %v1482_v19, %v1458_v39 }
 0x80e   : > { %v2158_v42 = vpop.eup %2157  ;;  %v1491_v45 = vmul.f32 %v1483_v38, %v1459_v37  ;;  %v1484_v47 = vadd.f32 1.0, %v2156_v23 }
 0x80f   : > { %v1493_v50 = vmul.f32 %v1485_v41, %v1461_v28  ;;  %v1486_v16 = vadd.f32 1.0, %v2158_v42 }
 0x810   : > { %v1560_v54 = vpack.c.bf16 %v1491_v45, %v1487_v35  ;;  %v1492_v1 = vmul.f32 %v1484_v47, %v1460_v46 }
 0x811   : > { %v1562_v56 = vpack.c.bf16 %v1493_v50, %v1489_v48  ;;  %v1494_v57 = vmul.f32 %v1486_v16, %v1462_v52 }
 0x812   : > { %v1561_v59 = vpack.c.bf16 %v1492_v1, %v1488_v53 }
 0x813   : > { %v1563_v32 = vpack.c.bf16 %v1494_v57, %v1490_v55 }
 0x814   : > { %1634 = vmatprep.mubr.bf16.mxu1 %v1561_v59 }
 0x815   : > { %1675 = vmatprep.mubr.bf16.mxu0 %v1563_v32  ;;  %1635 = vmatmul.mubr.bf16.vlgmr.msra.gmra.mrb[8].mxu1 %v1560_v54 }
 0x816   : > { %1676 = vmatmul.mubr.bf16.vlgmr.msra.gmra.mrb[12].mxu0 %v1562_v56 }
 0x8e8   : > { %v1903_v40 = vpop.f32.mrb[8].mxu1 }
 0x8e9   : > { %v1925_v60 = vpop.f32.mrb[12].mxu0  ;;  %v1904_v62 = vpop.f32.mrb[9].mxu1 }
 0x8ea   : > { %v1905_v63 = vadd.f32 %v1904_v62, %v1903_v40  ;;  %v1926_v2 = vpop.f32.mrb[13].mxu0  ;;  %v1906_v31 = vpop.f32.mrb[10].mxu1 }
 0x8eb   : > { %v1927_v14 = vadd.f32 %v1926_v2, %v1925_v60  ;;  %v1928_v4 = vpop.f32.mrb[14].mxu0  ;;  %v1907_v6 = vpop.f32.mrb[11].mxu1 }
 0x8ec   : > { %v1637_v7 = vadd.f32 %v1905_v63, %v1861_v61  ;;  %v1908_v9 = vadd.f32 %v1907_v6, %v1906_v31  ;;  %v1929_v51 = vpop.f32.mrb[15].mxu0 }
 0x8ed   : > { %v1930_v10 = vadd.f32 %v1929_v51, %v1928_v4 }
 0x8ee   : > { %v1678_v43 = vadd.f32 %v1927_v14, %v1637_v7  ;;  %v1640_v27 = vadd.f32 %v1908_v9, %v1861_v61 }
 0x8f0   : > { %v1684_v44 = vadd.f32 %v1678_v43, %v2959_v3  ;;  %v1681_v8 = vadd.f32 %v1930_v10, %v1640_v27 }
 0x8f2   : > { %1686 = vst [vmem:[%s649_s30] sm:$0xff] %v1684_v44  ;;  %v1685_v11 = vadd.f32 %v1681_v8, %v2963_v5 }
 0x8f4   : > { %1687 = vst [vmem:[%s649_s30 + $0x8] sm:$0xff] %v1685_v11 }
 0x8f5   : > { %2370 = shalt.err (!%p2367_p7)
}
 0x8f6   : > { %s2371_s1 = scalar_lea.hbm %s3003_s7, 256  ;;  %s2375_s30 = scalar_lea.hbm %s3117_s19, 1024 }
 0x8f7   : > { %p2372_p13 = scmp.ne.s32.totalorder %s3003_s7, %s2371_s1  ;;  %p2376_p8 = scmp.lt.u32.totalorder %s3003_s7, %s3117_s19 }
 0x8f8   : > { %p2377_p10 = scmp.lt.u32.totalorder %s2375_s30, %s2371_s1  ;;  %p2379_p5 = scmp.lt.u32.totalorder %s2371_s1, %s3003_s7 }
 0x8f9   : > { %p2373_p0 = pnand %p2372_p13, %p3118_p12 }
 0x8fa   : > { %p2378_p11 = por %p2377_p10, %p2376_p8 }
 0x8fb   : > { %p2374_p2 = pneg %p2373_p0 }
 0x8fc   : > { %p2380_p4 = por %p2379_p5, %p2378_p11 }
 0x8fe   : > { %p2381_p6 = pnand %p2380_p4, %p2374_p2 }
 0x900   : > { %2384 = shalt.err (!%p2381_p6)
}
 0x901   : > { %s2454_s29 = smov 128   ;;  %s2455_s28 = smov 8  }
 0x902   : > { %1997 = dma.vmem_to_hbm [thread:$0]  (%p3118_p12), %s2998_s17, 256, %s3003_s7, %s1689_s11, %s2454_s29, %s2454_s29, %s2455_s28  }
 0x903 PF: > { %p2039_p9 = scmp.ge.s32.totalorder %s2435_s27, 2  ;;  %s1717_s0 = sand.u32 1, %s2423_s24  }
 0x904   : > { %p3119_p1 = scmp.ne.s32.totalorder %s3100_s10, 0  ;;  %s1718_s23 = scalar_lea.sflag [#allocation5], %s1717_s0 }
 0x906   : > { %p2023_p3 = pnand %p2039_p9, %p3119_p1 }
 0x908   : > { %2418 = dma.done.wait (!%p2023_p3), %s1718_s23, 256  }
 0x909   : > { %2420 = vsyncadd (!%p2023_p3), %s1718_s23, 4294967040  ;;  %p33_p7 = scmp.ge.s32.totalorder %s2720_s18, 6   ;;  %s3120_s24 = smov %s2427_s25 }
 0x90a   : > { %s3121_s25 = smov %s2431_s26  ;;  %s3122_s26 = smov %s2731_s16 }
 0x90b   : > { %s3123_s27 = smov %s2720_s18  ;;  %35 = sbr.rel (!%p33_p7) target bundleno = 21 (0x15), region = 157 }
 0x912   :  { %1723 = vsyncpa [#allocation4], 1 }
 0x913   :  { %1725 = vsyncpa [#allocation4 + $0x1], 1 }
 0x914   :  { %1726 = vsyncpa [#allocation7], 1 }
 0x915   :  { %1727 = vsyncpa [#allocation10], 1 }
 0x916   :  { %1728 = vsyncpa [#allocation13], 1 }
 0x917   :  { %1729 = vsyncpa [#allocation5], 1 }
 0x918   :  { %1731 = vsyncpa [#allocation5 + $0x1], 1 }

</bundles_post_ra>
